<compile_context>
chip_gen: v7x
topology: tpu7x:2x2x1
jax: 0.10.0
libtpu: 0.0.40
codegen_flags: <defaults>
</compile_context>

<pallas_src>
import functools

import jax
import jax.numpy as jnp
from jax.experimental import pallas as pl
from jax.experimental.pallas import tpu as pltpu


def _round_up(x, m):
    return -(-x // m) * m


def _pad_filter_count(f):
    """Smallest f_pad >= f such that 128 % f_pad == 0 or f_pad % 128 == 0."""
    if f >= 128:
        return _round_up(f, 128)
    p = 1
    while p < f:
        p <<= 1
    return p


# ----------------------------------------------------------------------------
# In-kernel helpers
# ----------------------------------------------------------------------------
def _fold_positions(acc, filter_pad):
    """Reduce a (rows, col_group) running-max over its position groups.

    Columns are grouped (t, f) with t major; f_pad divides 128 or is a
    multiple of it, so every 128-lane block holds whole positions.
    Returns (rows, max(128, filter_pad)); for filter_pad < 128 every lane j
    holds the answer for filter j % filter_pad (cyclic roll-fold property).
    """
    rows, g = acc.shape
    w128 = max(128, filter_pad)
    m = acc[:, :w128]
    for k in range(1, g // w128):                 # lane-aligned 128-wide slabs
        m = jnp.maximum(m, acc[:, k * w128:(k + 1) * w128])
    span = w128
    while span > filter_pad:                      # XLU roll-folds, no relayout
        span //= 2
        m = jnp.maximum(m, pltpu.roll(m, shift=span, axis=1))
    return m


def _char_cnn_kernel(x_ref, v_ref, b_ref, o_ref, *, row_chunk, filter_pad,
                     col_group):
    """One batch tile.

    x_ref: (TN, C*L)             raw input rows, channel-major, lane-dense
    v_ref: (C*L, W_cols)         position-expanded conv weight (compute dtype)
    b_ref: (1, max(128, F_pad))  f32 bias, tiled across the 128 lanes
    o_ref: (TN, F_pad)           max-pooled conv output
    """
    tn = x_ref.shape[0]
    w_cols = v_ref.shape[1]
    n_groups = w_cols // col_group
    n_chunks = tn // row_chunk
    bias = b_ref[...]            # hoisted: one load per batch tile

    def compute(xb):
        xb = xb.astype(v_ref.dtype)              # no-op if x already bf16
        # Fused conv + max: never materialize the (rows, W_cols) slab; each
        # 256-wide MXU result is folded straight into the running max.
        acc = jnp.dot(xb, v_ref[:, :col_group],
                      preferred_element_type=jnp.float32)
        for g in range(1, n_groups):
            yg = jnp.dot(xb, v_ref[:, g * col_group:(g + 1) * col_group],
                         preferred_element_type=jnp.float32)
            acc = jnp.maximum(acc, yg)
        m = _fold_positions(acc, filter_pad)      # (rows, max(128, F_pad))
        return (m + bias)[:, :filter_pad]

    if n_chunks <= 1:
        o_ref[...] = compute(x_ref[...]).astype(o_ref.dtype)
    else:
        # Fully-unrolled row-chunk loop (n_chunks is small & static): static
        # offsets give the scheduler full cross-chunk visibility while each
        # chunk's live state stays one (row_chunk, col_group) accumulator.
        for i in range(n_chunks):
            r0 = i * row_chunk
            xb = x_ref[r0:r0 + row_chunk, :]
            o_ref[r0:r0 + row_chunk, :] = compute(xb).astype(o_ref.dtype)


# ----------------------------------------------------------------------------
# Wrapper-side helpers (all tiny, weight-sized work)
# ----------------------------------------------------------------------------
def _build_position_weights(weight, l_in, padding, f_pad, col_group,
                            compute_dtype):
    """V[(c*L + l), (t*F_pad + f)] = weight[f, c, l - t + padding] (0 outside).

    Filters are zero-padded to f_pad (sliced off by the wrapper); the column
    count is padded to a multiple of col_group with max-neutral copies of
    position 0.
    """
    f, c, w = weight.shape
    l_out = l_in + 2 * padding - w + 1
    if f_pad > f:
        weight = jnp.concatenate(
            [weight, jnp.zeros((f_pad - f, c, w), weight.dtype)], axis=0)
    t_idx = jnp.arange(l_out)
    l_idx = jnp.arange(l_in)
    k = l_idx[None, :] - t_idx[:, None] + padding         # (L_out, L) tap index
    valid = (k >= 0) & (k < w)
    kc = jnp.clip(k, 0, w - 1)
    w_cwf = jnp.transpose(weight, (1, 2, 0))              # (C, W, F_pad)
    v = jnp.where(valid[None, :, :, None], w_cwf[:, kc, :], 0.0)
    v = jnp.transpose(v, (0, 2, 1, 3)).reshape(c * l_in, l_out * f_pad)
    rem = (-(l_out * f_pad)) % col_group
    if rem:
        v = jnp.concatenate(
            [v, jnp.tile(v[:, :f_pad], (1, rem // f_pad))], axis=1)
    return v.astype(compute_dtype)


def _pick_batch_tile(n, row_bytes, target_block_bytes=2 << 20):
    """Largest divisor of n (mult. of 8) giving <= ~2 MB blocks; prefer >= 4
    grid steps (>= 2 per v7x core for intra-core DMA/compute overlap)."""
    cap = max(8, target_block_bytes // max(row_bytes, 1))
    divs = [d for d in range(1, n + 1) if n % d == 0]
    good = [d for d in divs if d % 8 == 0 and d <= cap]
    for min_steps in (4, 2):
        pref = [d for d in good if n // d >= min_steps]
        if pref:
            return max(pref)
    if good:
        return max(good)
    return n


def _pick_row_chunk(batch_tile, max_chunk):
    for rc in range(min(batch_tile, max_chunk), 7, -1):
        if batch_tile % rc == 0 and rc % 8 == 0:
            return rc
    return batch_tile


def _tpu_defaults():
    """(row_chunk, vmem_limit_cap) keyed on physical VMEM: 128 MiB (v5e/v6e)
    -> bigger chunks & 48 MiB cap; 64 MiB (v7x) or unknown -> conservative."""
    try:
        vmem_phys = int(pltpu.get_tpu_info().vmem_capacity_bytes)
    except Exception:  # noqa: BLE001 - any failure -> conservative defaults
        vmem_phys = 0
    if vmem_phys >= (100 << 20):
        return 512, 48 << 20        # v5e / v6e
    return 256, 40 << 20            # v7x (64 MiB VMEM) or unknown


# ----------------------------------------------------------------------------
# Public forward
# ----------------------------------------------------------------------------
@functools.partial(
    jax.jit,
    static_argnames=("padding", "batch_tile", "row_chunk", "f_pad",
                     "col_group", "compute_dtype", "vmem_limit"))
def _char_cnn_call(x, weight, bias, *, padding, batch_tile, row_chunk, f_pad,
                   col_group, compute_dtype, vmem_limit):
    n, c, l = x.shape
    f = weight.shape[0]
    # Free contiguous reshape: (N, C, L) -> (N, C*L). No transpose, no pad,
    # no extra HBM pass; blocks are lane-dense (last dim = C*L).
    x2 = x.reshape(n, c * l)
    v = _build_position_weights(weight, l, padding, f_pad, col_group,
                                compute_dtype)
    w_cols = v.shape[1]
    w128 = max(128, f_pad)
    b_pad = bias if f_pad == f else jnp.concatenate(
        [bias, jnp.zeros((f_pad - f,), bias.dtype)])
    b2 = jnp.tile(b_pad, w128 // f_pad).reshape(1, w128).astype(jnp.float32)

    grid = (n // batch_tile,)
    kernel = functools.partial(_char_cnn_kernel, row_chunk=row_chunk,
                               filter_pad=f_pad, col_group=col_group)
    out = pl.pallas_call(
        kernel,
        out_shape=jax.ShapeDtypeStruct((n, f_pad), x.dtype),
        grid=grid,
        in_specs=[
            pl.BlockSpec((batch_tile, c * l), lambda i: (i, 0)),
            pl.BlockSpec((c * l, w_cols), lambda i: (0, 0)),   # resident weight
            pl.BlockSpec((1, w128), lambda i: (0, 0)),         # resident bias
        ],
        out_specs=pl.BlockSpec((batch_tile, f_pad), lambda i: (i, 0)),
        compiler_params=pltpu.CompilerParams(
            dimension_semantics=("parallel",),
            vmem_limit_bytes=vmem_limit),
    )(x2, v, b2)
    if f_pad != f:
        out = out[:, :f]        # only for filter counts needing lane padding
    return out


def char_cnn_forward(x, weight, bias, *, padding, batch_tile=None,
                     row_chunk=None, compute_dtype=jnp.bfloat16):
    """x: (N, e_char, L), weight: (F, e_char, W), bias: (F,) -> (N, F)."""
    n, c, l = x.shape
    f, c2, w = weight.shape
    if c2 != c:
        raise ValueError("channel mismatch between x and weight")
    l_out = l + 2 * padding - w + 1
    if l_out < 1:
        raise ValueError("window larger than padded input")

    f_pad = _pad_filter_count(f)
    # 256-wide column groups feed the full 2x256^2 MXU on v6e/v7x; on v5e the
    # compiler splits each group into two 128-wide MXU pushes (no harm).
    col_group = 256 if 256 % f_pad == 0 else f_pad
    rc_default, vmem_cap = _tpu_defaults()

    itemsize = jnp.dtype(x.dtype).itemsize
    if batch_tile is None:
        batch_tile = _pick_batch_tile(n, c * l * itemsize)
    if n % batch_tile != 0:
        raise ValueError("batch_tile must divide N")
    rc = min(row_chunk if row_chunk is not None else rc_default, batch_tile)
    if batch_tile % rc != 0 or rc % 8 != 0:
        rc = _pick_row_chunk(batch_tile, rc)

    # VMEM budget: double-buffered in/out blocks, resident V counted ONCE
    # (constant index_map -> single buffer), one fused-max accumulator + one
    # in-flight MXU result slab, plus headroom. Capped per generation so we
    # never request more than ~60% of v7x's 64 MiB physical VMEM.
    w_cols = _round_up(l_out * f_pad, col_group)
    est = (2 * batch_tile * c * l * itemsize
           + 2 * batch_tile * f_pad * itemsize
           + c * l * w_cols * jnp.dtype(compute_dtype).itemsize
           + 2 * rc * col_group * 4
           + (2 << 20))
    vmem_limit = int(min(vmem_cap, max(24 << 20, 2 * est)))

    return _char_cnn_call(x, weight, bias, padding=padding,
                          batch_tile=batch_tile, row_chunk=rc, f_pad=f_pad,
                          col_group=col_group, compute_dtype=compute_dtype,
                          vmem_limit=vmem_limit)


# ----------------------------------------------------------------------------
# Reference + tests
# ----------------------------------------------------------------------------
def _reference(x_ncl, weight, bias, padding):
    """Pure-JAX reference matching nn.Conv1d + max over last dim."""
    y = jax.lax.conv_general_dilated(
        x_ncl, weight, window_strides=(1,), padding=[(padding, padding)],
        dimension_numbers=("NCH", "OIH", "NCH"))
    y = y + bias[None, :, None]
    return jnp.max(y, axis=-1)


def _run_case(key, n, e_char, max_word_len, filter_num, window_size, padding):
    kx, kw, kb = jax.random.split(key, 3)
    x = jax.random.normal(kx, (n, e_char, max_word_len), dtype=jnp.float32)
    weight = 0.1 * jax.random.normal(
        kw, (filter_num, e_char, window_size), dtype=jnp.float32)
    bias = 0.1 * jax.random.normal(kb, (filter_num,), dtype=jnp.float32)

    out = char_cnn_forward(x, weight, bias, padding=padding)
    out = jax.block_until_ready(out)

    ref = _reference(x, weight, bias, padding)
    assert out.shape == (n, filter_num)
    err = float(jnp.max(jnp.abs(out - ref)))
    assert jnp.allclose(out, ref, atol=3e-2, rtol=3e-2), (
        f"mismatch vs reference, max|err|={err}")


if __name__ == "__main__":
    key = jax.random.PRNGKey(0)
    k1, k2, k3 = jax.random.split(key, 3)

    # Primary config (word batch of a char-CNN): N words, e_char=16, L=16.
    _run_case(k1, n=2048, e_char=16, max_word_len=16,
              filter_num=32, window_size=5, padding=2)

    # Secondary config exercising odd dims / position-padding path.
    _run_case(k2, n=48, e_char=20, max_word_len=21,
              filter_num=64, window_size=5, padding=2)

    # Small config exercising the filter-padding path (F=20 -> f_pad=32).
    _run_case(k3, n=32, e_char=8, max_word_len=12,
              filter_num=20, window_size=3, padding=1)

    print("KERNEL_OK")
</pallas_src>

<mosaic_0001>
module attributes {stable_mosaic.version = 11 : i64} {
  func.func @_char_cnn_kernel(%arg0: i32, %arg1: memref<512x256xf32, #tpu.memory_space<vmem>>, %arg2: memref<256x512xbf16, #tpu.memory_space<vmem>>, %arg3: memref<1x128xf32, #tpu.memory_space<vmem>>, %arg4: memref<512x32xf32, #tpu.memory_space<vmem>>) attributes {dimension_semantics = [#tpu.dimension_semantics<parallel>], iteration_bounds = array<i64: 4>, scalar_prefetch = 0 : i64, scratch_operands = 0 : i64, tpu.core_type = #tpu.core_type<tc>, window_params = [{transform_indices = @transform_0, window_bounds = array<i64: 512, 256>}, {pipeline_mode = #tpu.pipeline_mode<synchronous>, transform_indices = @transform_1, window_bounds = array<i64: 256, 512>}, {pipeline_mode = #tpu.pipeline_mode<synchronous>, transform_indices = @transform_2, window_bounds = array<i64: 1, 128>}, {transform_indices = @transform_3, window_bounds = array<i64: 512, 32>}]} {
    %c0 = arith.constant 0 : index
    %c0_0 = arith.constant 0 : index
    %0 = vector.load %arg3[%c0, %c0_0] : memref<1x128xf32, #tpu.memory_space<vmem>>, vector<1x128xf32>
    %c0_1 = arith.constant 0 : index
    %c0_2 = arith.constant 0 : index
    %1 = vector.load %arg1[%c0_1, %c0_2] : memref<512x256xf32, #tpu.memory_space<vmem>>, vector<256x256xf32>
    %2 = arith.truncf %1 : vector<256x256xf32> to vector<256x256xbf16>
    %c0_3 = arith.constant 0 : index
    %c0_4 = arith.constant 0 : index
    %3 = vector.load %arg2[%c0_3, %c0_4] : memref<256x512xbf16, #tpu.memory_space<vmem>>, vector<256x256xbf16>
    %cst = arith.constant dense<0.000000e+00> : vector<256x256xf32>
    %4 = tpu.matmul %2, %3, %cst {dimension_numbers = #tpu.dot_dimension_numbers<[1], [0], [0], [1], [0, 0, 1, 1], [], []>} : vector<256x256xbf16>, vector<256x256xbf16>, vector<256x256xf32> -> vector<256x256xf32>
    %c0_5 = arith.constant 0 : index
    %c256 = arith.constant 256 : index
    %5 = vector.load %arg2[%c0_5, %c256] : memref<256x512xbf16, #tpu.memory_space<vmem>>, vector<256x256xbf16>
    %cst_6 = arith.constant dense<0.000000e+00> : vector<256x256xf32>
    %6 = tpu.matmul %2, %5, %cst_6 {dimension_numbers = #tpu.dot_dimension_numbers<[1], [0], [0], [1], [0, 0, 1, 1], [], []>} : vector<256x256xbf16>, vector<256x256xbf16>, vector<256x256xf32> -> vector<256x256xf32>
    %7 = arith.maximumf %4, %6 : vector<256x256xf32>
    %8 = vector.extract_strided_slice %7 {offsets = [0, 0], sizes = [256, 128], strides = [1, 1]} : vector<256x256xf32> to vector<256x128xf32>
    %9 = vector.extract_strided_slice %7 {offsets = [0, 128], sizes = [256, 128], strides = [1, 1]} : vector<256x256xf32> to vector<256x128xf32>
    %10 = arith.maximumf %8, %9 : vector<256x128xf32>
    %c64_i32 = arith.constant 64 : i32
    %11 = tpu.dynamic_rotate %10 by %c64_i32 dim 1 : vector<256x128xf32>, i32 -> vector<256x128xf32>
    %12 = arith.maximumf %10, %11 : vector<256x128xf32>
    %c32_i32 = arith.constant 32 : i32
    %13 = tpu.dynamic_rotate %12 by %c32_i32 dim 1 : vector<256x128xf32>, i32 -> vector<256x128xf32>
    %14 = arith.maximumf %12, %13 : vector<256x128xf32>
    %15 = vector.broadcast %0 : vector<1x128xf32> to vector<256x128xf32>
    %16 = arith.addf %14, %15 : vector<256x128xf32>
    %17 = vector.extract_strided_slice %16 {offsets = [0, 0], sizes = [256, 32], strides = [1, 1]} : vector<256x128xf32> to vector<256x32xf32>
    %c0_7 = arith.constant 0 : index
    %c0_8 = arith.constant 0 : index
    %18 = vector.load %arg4[%c0_7, %c0_8] : memref<512x32xf32, #tpu.memory_space<vmem>>, vector<256x32xf32>
    tpu.vector_store %arg4[%c0_7, %c0_8], %17 {strides = array<i32>} : memref<512x32xf32, #tpu.memory_space<vmem>>, vector<256x32xf32>,
    %c256_9 = arith.constant 256 : index
    %c0_10 = arith.constant 0 : index
    %19 = vector.load %arg1[%c256_9, %c0_10] : memref<512x256xf32, #tpu.memory_space<vmem>>, vector<256x256xf32>
    %20 = arith.truncf %19 : vector<256x256xf32> to vector<256x256xbf16>
    %c0_11 = arith.constant 0 : index
    %c0_12 = arith.constant 0 : index
    %21 = vector.load %arg2[%c0_11, %c0_12] : memref<256x512xbf16, #tpu.memory_space<vmem>>, vector<256x256xbf16>
    %cst_13 = arith.constant dense<0.000000e+00> : vector<256x256xf32>
    %22 = tpu.matmul %20, %21, %cst_13 {dimension_numbers = #tpu.dot_dimension_numbers<[1], [0], [0], [1], [0, 0, 1, 1], [], []>} : vector<256x256xbf16>, vector<256x256xbf16>, vector<256x256xf32> -> vector<256x256xf32>
    %c0_14 = arith.constant 0 : index
    %c256_15 = arith.constant 256 : index
    %23 = vector.load %arg2[%c0_14, %c256_15] : memref<256x512xbf16, #tpu.memory_space<vmem>>, vector<256x256xbf16>
    %cst_16 = arith.constant dense<0.000000e+00> : vector<256x256xf32>
    %24 = tpu.matmul %20, %23, %cst_16 {dimension_numbers = #tpu.dot_dimension_numbers<[1], [0], [0], [1], [0, 0, 1, 1], [], []>} : vector<256x256xbf16>, vector<256x256xbf16>, vector<256x256xf32> -> vector<256x256xf32>
    %25 = arith.maximumf %22, %24 : vector<256x256xf32>
    %26 = vector.extract_strided_slice %25 {offsets = [0, 0], sizes = [256, 128], strides = [1, 1]} : vector<256x256xf32> to vector<256x128xf32>
    %27 = vector.extract_strided_slice %25 {offsets = [0, 128], sizes = [256, 128], strides = [1, 1]} : vector<256x256xf32> to vector<256x128xf32>
    %28 = arith.maximumf %26, %27 : vector<256x128xf32>
    %c64_i32_17 = arith.constant 64 : i32
    %29 = tpu.dynamic_rotate %28 by %c64_i32_17 dim 1 : vector<256x128xf32>, i32 -> vector<256x128xf32>
    %30 = arith.maximumf %28, %29 : vector<256x128xf32>
    %c32_i32_18 = arith.constant 32 : i32
    %31 = tpu.dynamic_rotate %30 by %c32_i32_18 dim 1 : vector<256x128xf32>, i32 -> vector<256x128xf32>
    %32 = arith.maximumf %30, %31 : vector<256x128xf32>
    %33 = vector.broadcast %0 : vector<1x128xf32> to vector<256x128xf32>
    %34 = arith.addf %32, %33 : vector<256x128xf32>
    %35 = vector.extract_strided_slice %34 {offsets = [0, 0], sizes = [256, 32], strides = [1, 1]} : vector<256x128xf32> to vector<256x32xf32>
    %c256_19 = arith.constant 256 : index
    %c0_20 = arith.constant 0 : index
    %36 = vector.load %arg4[%c256_19, %c0_20] : memref<512x32xf32, #tpu.memory_space<vmem>>, vector<256x32xf32>
    tpu.vector_store %arg4[%c256_19, %c0_20], %35 {strides = array<i32>} : memref<512x32xf32, #tpu.memory_space<vmem>>, vector<256x32xf32>,
    return
  }
  func.func @transform_0(%arg0: i32) -> (i32, i32) {
    %c0_i32 = arith.constant 0 : i32
    %c0_i32_0 = arith.constant 0 : i32
    return %arg0, %c0_i32 : i32, i32
  }
  func.func @transform_1(%arg0: i32) -> (i32, i32) {
    %c0_i32 = arith.constant 0 : i32
    %c0_i32_0 = arith.constant 0 : i32
    %c0_i32_1 = arith.constant 0 : i32
    return %c0_i32, %c0_i32_0 : i32, i32
  }
  func.func @transform_2(%arg0: i32) -> (i32, i32) {
    %c0_i32 = arith.constant 0 : i32
    %c0_i32_0 = arith.constant 0 : i32
    %c0_i32_1 = arith.constant 0 : i32
    return %c0_i32, %c0_i32_0 : i32, i32
  }
  func.func @transform_3(%arg0: i32) -> (i32, i32) {
    %c0_i32 = arith.constant 0 : i32
    %c0_i32_0 = arith.constant 0 : i32
    return %arg0, %c0_i32 : i32, i32
  }
}

</mosaic_0001>

<bundles_post_ra>
// kernel: tile.9
= control target key start
LH: loop header
LB: loop body
LE: loop exit
PB: predicated region body
PF: predicated region fallthrough
CT: control target
= control target key end

     0   :  { %vm7_vm0 = vcmask 261120   ;;  %s37_s8 = smov 32   ;;  %s38_s9 = smov 64   ;;  %vm13_vm1 = vcmask 1048320   ;;  %vm19_vm2 = vcmask 785920   ;;  %vm25_vm3 = vcmask 523520   ;;  %s55_s0 = inlined_call_operand.vmem [shape: f32[4,32], index: 0, kind: input, shape index: {}]   ;;  %s56_s1 = inlined_call_operand.vmem [shape: f32[1,128], index: 1, kind: output, shape index: {}]  }
   0x1   :  { %v4_v0 = vld [vmem:[%s55_s0] sm:$0xf]  ;;  %s36_s0 = smov 96  }
   0x2   :  { %5 = vst [vmem:[#allocation1] sm:$0xf] %v4_v0 }
   0x9   :  { %v10_v1 = vld [vmem:[#allocation1 + $0x3] sm:$0x1]   ;;  %v22_v2 = vld [vmem:[#allocation1 + $0x1] sm:$0x1]   ;;  %v6_v3 = vld [vmem:[#allocation1] sm:$0x1]  }
   0xa   :  { %11 = vrot.lane.b32.xlu0 %v10_v1, %s36_s0  ;;  %23 = vrot.lane.b32.xlu1 %v22_v2, %s37_s8  ;;  %v16_v4 = vld [vmem:[#allocation1 + $0x2] sm:$0x1]   ;;  %8 = vst.msk [vmem:[#allocation0] sm:$0x1] %vm7_vm0, %v6_v3  }
   0xe   :  { %17 = vrot.lane.b32.xlu0 %v16_v4, %s38_s9 }
  0x7c   :  { %v12_v5 = vpop.permute.xlu0 %11   ;;  %v24_v6 = vpop.permute.xlu1 %23  }
  0x7d   :  { %14 = vst.msk [vmem:[#allocation0] sm:$0x1] %vm13_vm1, %v12_v5  }
  0x80   :  { %v18_v7 = vpop.permute.xlu0 %17  }
  0x81   :  { %20 = vst.msk [vmem:[#allocation0] sm:$0x1] %vm19_vm2, %v18_v7  }
  0x82   :  { %26 = vst.msk [vmem:[#allocation0] sm:$0x1] %vm25_vm3, %v24_v6  }
  0x89   :  { %v30_v8 = vld [vmem:[#allocation0] sm:$0x1] }
  0x8a   :  { %32 = vst [vmem:[%s56_s1] sm:$0x1] %v30_v8 }

// kernel: tile.8
= control target key start
LH: loop header
LB: loop body
LE: loop exit
PB: predicated region body
PF: predicated region fallthrough
CT: control target
= control target key end

     0   :  { %2 = vsyncpa [#allocation1], 0  ;;  %s44_s6 = smov [#allocation0]   ;;  %s70_s0 = inlined_call_operand.hbm [shape: f32[32], index: 0, kind: input, shape index: {}]   ;;  %s71_s1 = inlined_call_operand.vmem [shape: f32[4,32], index: 1, kind: output, shape index: {}]  }
   0x1   :  { %s9_s7 = sshll.u32 %s44_s6, 4  ;;  %s20_s10 = scalar_lea.hbm %s70_s0, 16  ;;  %s10_s7 = int_to_ptr.vmem [resolvable:$true] %s9_s7 }
   0x2   :  { %p21_p0 = scmp.ne.s32.totalorder %s70_s0, %s20_s10  ;;  %p24_p1 = scmp.lt.u32.totalorder %s20_s10, %s70_s0 }
   0x4   :  { %p26_p2 = pnand %p24_p1, %p21_p0 }
   0x6   :  { %29 = shalt.err (!%p26_p2)
}
   0x7   :  { %s30_s15 = scalar_lea.vmem %s10_s7, 16  ;;  %s34_s16 = scalar_lea.vmem %s10_s7, 32 }
   0x8   :  { %p31_p3 = scmp.ne.s32.totalorder %s10_s7, %s30_s15  ;;  %p35_p4 = scmp.lt.s32.totalorder %s10_s7, %s10_s7 }
   0x9   :  { %p36_p5 = scmp.lt.s32.totalorder %s34_s16, %s30_s15 }
   0xb   :  { %p37_p6 = por %p36_p5, %p35_p4 }
   0xd   :  { %p38_p7 = pnand %p37_p6, %p31_p3 }
   0xf   :  { %41 = shalt.err (!%p38_p7)
}
  0x10   :  { %12 = dma.hbm_to_vmem [thread:$0]  %s70_s0, 16, %s10_s7, [#allocation1]  }
  0x11   :  { %42 = dma.done.wait [#allocation1], 16  }
  0x12   :  { %43 = vsyncadd [#allocation1], 4294967280  ;;  %v16_v0 = vld [vmem:[#allocation0] ss:$0 sm:$0xff] }
  0x13   :  { %17 = vst [vmem:[%s71_s1] sm:$0xf] %v16_v0 }
  0x14   :  { %18 = vsyncpa [#allocation1], 1 }

// kernel: _char_cnn_call.1
= control target key start
LH: loop header
LB: loop body
LE: loop exit
PB: predicated region body
PF: predicated region fallthrough
CT: control target
= control target key end

     0   :  { %s2955_s12 = smov 0   ;;  %s4395_s0 = inlined_call_operand.vmem [shape: f32[2048,256], index: 0, kind: input, shape index: {}]   ;;  %s4396_s1 = inlined_call_operand.vmem [shape: bf16[256,512], index: 1, kind: input, shape index: {}]   ;;  %s4397_s2 = inlined_call_operand.vmem [shape: f32[1,128], index: 2, kind: input, shape index: {}]   ;;  %s4398_s3 = inlined_call_operand.vmem [shape: f32[2048,32], index: 3, kind: output, shape index: {}]  }
   0x1 LB: > { %s2677_s13 = sadd.s32 4294967295, %s2931_s12   ;;  %p2681_p0 = scmp.ge.s32.totalorder %s2931_s12, 1  ;;  %s2931_s12 = sphi %s2955_s12, %s13_s12  }
   0x2   : > { %p139_p1 = scmp.lt.s32.totalorder %s2931_s12, 5 }
   0x4   : > { %p140_p2 = pnand %p2681_p0, %p139_p1 }
   0x6   : > { %143 = sbr.rel (%p140_p2) target bundleno = 786 (0x312), region = 32 }
   0xd   : > { %v2966_v0 = vld [vmem:[%s4396_s1 + $0x4] ss:$16 sps:$4 sm:$0xff]   ;;  %v2971_v1 = vld [vmem:[%s4396_s1 + $0xc] ss:$16 sps:$4 sm:$0xff]   ;;  %v2977_v2 = vld [vmem:[%s4396_s1] ss:$16 sps:$4 sm:$0xff]  }
   0xe   : > { %466 = vmatprep.subr.bf16.mxu0 %v2966_v0  ;;  %v2982_v3 = vld [vmem:[%s4396_s1 + $0x8] ss:$16 sps:$4 sm:$0xff]   ;;  %851 = vmatprep.subr.bf16.mxu1 %v2971_v1  ;;  %v2988_v4 = vld [vmem:[%s4396_s1 + $0x24] ss:$16 sps:$4 sm:$0xff]   ;;  %v2995_v5 = vld [vmem:[%s4396_s1 + $0x2c] ss:$16 sps:$4 sm:$0xff]  }
   0xf   : > { %467 = vmatpush1.bf16.msra.mxu0 %v2977_v2  ;;  %852 = vmatpush1.bf16.msra.mxu1 %v2982_v3  ;;  %v3000_v6 = vld [vmem:[%s4396_s1 + $0x20] ss:$16 sps:$4 sm:$0xff]   ;;  %v3006_v7 = vld [vmem:[%s4396_s1 + $0x28] ss:$16 sps:$4 sm:$0xff]   ;;  %v3012_v8 = vld [vmem:[%s4396_s1 + $0x44] ss:$16 sps:$4 sm:$0xff]  }
  0x10   : > { %468 = vmatprep.subr.bf16.mxu0 %v2988_v4  ;;  %853 = vmatprep.subr.bf16.mxu1 %v2995_v5  ;;  %v3017_v9 = vld [vmem:[%s4396_s1 + $0x4c] ss:$16 sps:$4 sm:$0xff]   ;;  %v3022_v10 = vld [vmem:[%s4396_s1 + $0x40] ss:$16 sps:$4 sm:$0xff]   ;;  %v3027_v11 = vld [vmem:[%s4396_s1 + $0x48] ss:$16 sps:$4 sm:$0xff]  }
  0x11   : > { %v3034_v12 = vld [vmem:[%s4396_s1 + $0x64] ss:$16 sps:$4 sm:$0xff]   ;;  %v3041_v13 = vld [vmem:[%s4396_s1 + $0x6c] ss:$16 sps:$4 sm:$0xff]   ;;  %v3046_v14 = vld [vmem:[%s4396_s1 + $0x60] ss:$16 sps:$4 sm:$0xff]  }
  0x12   : > { %v3053_v15 = vld [vmem:[%s4396_s1 + $0x68] ss:$16 sps:$4 sm:$0xff]   ;;  %v3058_v16 = vld [vmem:[%s4396_s1 + $0x84] ss:$16 sps:$4 sm:$0xff]   ;;  %v3065_v17 = vld [vmem:[%s4396_s1 + $0x8c] ss:$16 sps:$4 sm:$0xff]  }
  0x13   : > { %469 = vmatpush1.bf16.msra.mxu0 %v3000_v6  ;;  %854 = vmatpush1.bf16.msra.mxu1 %v3006_v7  ;;  %v3070_v18 = vld [vmem:[%s4396_s1 + $0x80] ss:$16 sps:$4 sm:$0xff]   ;;  %v3075_v19 = vld [vmem:[%s4396_s1 + $0x88] ss:$16 sps:$4 sm:$0xff]   ;;  %v3082_v20 = vld [vmem:[%s4396_s1 + $0xa4] ss:$16 sps:$4 sm:$0xff]  }
  0x14   : > { %470 = vmatprep.subr.bf16.mxu0 %v3012_v8  ;;  %855 = vmatprep.subr.bf16.mxu1 %v3017_v9  ;;  %v3089_v21 = vld [vmem:[%s4396_s1 + $0xac] ss:$16 sps:$4 sm:$0xff]   ;;  %v3094_v22 = vld [vmem:[%s4396_s1 + $0xa0] ss:$16 sps:$4 sm:$0xff]   ;;  %v3101_v23 = vld [vmem:[%s4396_s1 + $0xa8] ss:$16 sps:$4 sm:$0xff]  }
  0x15   : > { %v3106_v24 = vld [vmem:[%s4396_s1 + $0xc4] ss:$16 sps:$4 sm:$0xff]   ;;  %v3113_v25 = vld [vmem:[%s4396_s1 + $0xcc] ss:$16 sps:$4 sm:$0xff]   ;;  %v3118_v26 = vld [vmem:[%s4396_s1 + $0xc0] ss:$16 sps:$4 sm:$0xff]  }
  0x16   : > { %v3123_v27 = vld [vmem:[%s4396_s1 + $0xc8] ss:$16 sps:$4 sm:$0xff]   ;;  %v3130_v28 = vld [vmem:[%s4396_s1 + $0xe4] ss:$16 sps:$4 sm:$0xff]   ;;  %v3137_v29 = vld [vmem:[%s4396_s1 + $0xec] ss:$16 sps:$4 sm:$0xff]  }
  0x17   : > { %471 = vmatpush1.bf16.msra.mxu0 %v3022_v10  ;;  %856 = vmatpush1.bf16.msra.mxu1 %v3027_v11  ;;  %s2682_s24 = sshll.u32 %s2677_s13, 6  ;;  %v3144_v30 = vld [vmem:[%s4396_s1 + $0xe0] ss:$16 sps:$4 sm:$0xff]   ;;  %v3151_v31 = vld [vmem:[%s4396_s1 + $0xe8] ss:$16 sps:$4 sm:$0xff]   ;;  %s2933_s22 = smov 64  }
  0x18   : > { %472 = vmatprep.subr.bf16.mxu0 %v3034_v12  ;;  %857 = vmatprep.subr.bf16.mxu1 %v3041_v13  ;;  %v3156_v32 = vld [vmem:[%s4396_s1 + $0x104] ss:$16 sps:$4 sm:$0xff]   ;;  %p165_p3 = scmp.lt.s32.totalorder %s2682_s24, 255  ;;  %v3163_v33 = vld [vmem:[%s4396_s1 + $0x10c] ss:$16 sps:$4 sm:$0xff]   ;;  %vm1370_vm0 = vcmask 261120  }
  0x19   : > { %v3168_v34 = vld [vmem:[%s4396_s1 + $0x100] ss:$16 sps:$4 sm:$0xff]   ;;  %v3173_v35 = vld [vmem:[%s4396_s1 + $0x108] ss:$16 sps:$4 sm:$0xff]   ;;  %v3180_v36 = vld [vmem:[%s4396_s1 + $0x124] ss:$16 sps:$4 sm:$0xff]  }
  0x1a   : > { %s4460_s24 = smov (!%p165_p3, %s2682_s24), 255  ;;  %v3189_v37 = vld [vmem:[%s4396_s1 + $0x12c] ss:$16 sps:$4 sm:$0xff]   ;;  %v3194_v38 = vld [vmem:[%s4396_s1 + $0x120] ss:$16 sps:$4 sm:$0xff]  }
  0x1b   : > { %473 = vmatpush1.bf16.msra.mxu0 %v3046_v14  ;;  %858 = vmatpush1.bf16.msra.mxu1 %v3053_v15  ;;  %v3201_v39 = vld [vmem:[%s4396_s1 + $0x128] ss:$16 sps:$4 sm:$0xff]   ;;  %v3206_v40 = vld [vmem:[%s4396_s1 + $0x144] ss:$16 sps:$4 sm:$0xff]   ;;  %s2818_s21 = sshll.u32 %s4460_s24, 4  ;;  %s2686_s23 = sshll.u32 %s4460_s24, 3 }
  0x1c   : > { %474 = vmatprep.subr.bf16.mxu0 %v3058_v16  ;;  %859 = vmatprep.subr.bf16.mxu1 %v3065_v17  ;;  %v3214_v41 = vld [vmem:[%s4396_s1 + $0x14c] ss:$16 sps:$4 sm:$0xff]   ;;  %v3219_v42 = vld [vmem:[%s4396_s1 + $0x140] ss:$16 sps:$4 sm:$0xff]   ;;  %v3224_v43 = vld [vmem:[%s4396_s1 + $0x148] ss:$16 sps:$4 sm:$0xff]   ;;  %s3229_s13 = scalar_lea.vmem %s4395_s0, %s2818_s21  ;;  %s3943_s24 = scalar_lea.vmem %s4398_s3, %s2686_s23 }
  0x1d   : > { %v3236_v44 = vld [vmem:[%s4396_s1 + $0x164] ss:$16 sps:$4 sm:$0xff]   ;;  %v3243_v45 = vld [vmem:[%s4396_s1 + $0x16c] ss:$16 sps:$4 sm:$0xff]   ;;  %v3252_v48 = vld [vmem:[%s4396_s1 + $0x160] ss:$16 sps:$4 sm:$0xff]  }
  0x1e   : > { %v179_v46 = vld [vmem:[%s3229_s13 + $0x8] sm:$0xff]  ;;  %v181_v47 = vld [vmem:[%s3229_s13 + $0x18] sm:$0xff]  ;;  %v3264_v51 = vld [vmem:[%s4396_s1 + $0x184] ss:$16 sps:$4 sm:$0xff]  }
  0x1f   : > { %475 = vmatpush1.bf16.msra.mxu0 %v3070_v18  ;;  %860 = vmatpush1.bf16.msra.mxu1 %v3075_v19  ;;  %v3257_v49 = vld [vmem:[%s4396_s1 + $0x168] ss:$16 sps:$4 sm:$0xff]   ;;  %v243_v50 = vpack.c.bf16 %v181_v47, %v179_v46  ;;  %v3269_v52 = vld [vmem:[%s4396_s1 + $0x18c] ss:$16 sps:$4 sm:$0xff]   ;;  %v3276_v53 = vld [vmem:[%s4396_s1 + $0x180] ss:$16 sps:$4 sm:$0xff]  }
  0x20   : > { %476 = vmatprep.subr.bf16.mxu0 %v3082_v20  ;;  %861 = vmatprep.subr.bf16.mxu1 %v3089_v21  ;;  %v3281_v54 = vld [vmem:[%s4396_s1 + $0x188] ss:$16 sps:$4 sm:$0xff]   ;;  %v3288_v55 = vld [vmem:[%s4396_s1 + $0x1a4] ss:$16 sps:$4 sm:$0xff]   ;;  %v3293_v56 = vld [vmem:[%s4396_s1 + $0x1ac] ss:$16 sps:$4 sm:$0xff]  }
  0x21   : > { %498 = vmatprep.mubr.bf16.mxu0 %v243_v50  ;;  %883 = vmatprep.mubr.bf16.mxu1 %v243_v50  ;;  %v3300_v57 = vld [vmem:[%s4396_s1 + $0x1a0] ss:$16 sps:$4 sm:$0xff]   ;;  %v3305_v58 = vld [vmem:[%s4396_s1 + $0x1a8] ss:$16 sps:$4 sm:$0xff]   ;;  %v3312_v59 = vld [vmem:[%s4396_s1 + $0x1c4] ss:$16 sps:$4 sm:$0xff]  }
  0x22   : > { %4419 = vst [vmem:[#allocation2_spill] sm:$0xff] %v3300_v57  ;;  %4420 = vst [vmem:[#allocation3_spill] sm:$0xff] %v3305_v58  ;;  %v3317_v60 = vld [vmem:[%s4396_s1 + $0x1cc] ss:$16 sps:$4 sm:$0xff]   ;;  %v3324_v61 = vld [vmem:[%s4396_s1 + $0x1c0] ss:$16 sps:$4 sm:$0xff]  }
  0x23   : > { %477 = vmatpush1.bf16.msra.mxu0 %v3094_v22  ;;  %862 = vmatpush1.bf16.msra.mxu1 %v3101_v23  ;;  %4421 = vst [vmem:[#allocation4_spill] sm:$0xff] %v3312_v59  ;;  %4422 = vst [vmem:[#allocation5_spill] sm:$0xff] %v3317_v60  ;;  %v3329_v62 = vld [vmem:[%s4396_s1 + $0x1c8] ss:$16 sps:$4 sm:$0xff]   ;;  %v3336_v63 = vld [vmem:[%s4396_s1 + $0x1e4] ss:$16 sps:$4 sm:$0xff]  }
  0x24   : > { %478 = vmatprep.subr.bf16.mxu0 %v3106_v24  ;;  %863 = vmatprep.subr.bf16.mxu1 %v3113_v25  ;;  %4423 = vst [vmem:[#allocation6_spill] sm:$0xff] %v3324_v61  ;;  %4424 = vst [vmem:[#allocation7_spill] sm:$0xff] %v3329_v62  ;;  %v3341_v46 = vld [vmem:[%s4396_s1 + $0x1ec] ss:$16 sps:$4 sm:$0xff]   ;;  %v3346_v47 = vld [vmem:[%s4396_s1 + $0x1e0] ss:$16 sps:$4 sm:$0xff]  }
  0x25   : > { %4425 = vst [vmem:[#allocation8_spill] sm:$0xff] %v3336_v63  ;;  %4426 = vst [vmem:[#allocation9_spill] sm:$0xff] %v3341_v46  ;;  %v3353_v50 = vld [vmem:[%s4396_s1 + $0x1e8] ss:$16 sps:$4 sm:$0xff]  }
  0x27   : > { %479 = vmatpush1.bf16.msra.mxu0 %v3118_v26  ;;  %864 = vmatpush1.bf16.msra.mxu1 %v3123_v27 }
  0x28   : > { %480 = vmatprep.subr.bf16.mxu0 %v3130_v28  ;;  %865 = vmatprep.subr.bf16.mxu1 %v3137_v29 }
  0x2b   : > { %481 = vmatpush1.bf16.msra.mxu0 %v3144_v30  ;;  %866 = vmatpush1.bf16.msra.mxu1 %v3151_v31 }
  0x2c   : > { %482 = vmatprep.subr.bf16.mxu0 %v3156_v32  ;;  %867 = vmatprep.subr.bf16.mxu1 %v3163_v33 }
  0x2f   : > { %483 = vmatpush1.bf16.msra.mxu0 %v3168_v34  ;;  %868 = vmatpush1.bf16.msra.mxu1 %v3173_v35 }
  0x30   : > { %484 = vmatprep.subr.bf16.mxu0 %v3180_v36  ;;  %869 = vmatprep.subr.bf16.mxu1 %v3189_v37 }
  0x33   : > { %485 = vmatpush1.bf16.msra.mxu0 %v3194_v38  ;;  %870 = vmatpush1.bf16.msra.mxu1 %v3201_v39 }
  0x34   : > { %486 = vmatprep.subr.bf16.mxu0 %v3206_v40  ;;  %871 = vmatprep.subr.bf16.mxu1 %v3214_v41 }
  0x37   : > { %487 = vmatpush1.bf16.msra.mxu0 %v3219_v42  ;;  %872 = vmatpush1.bf16.msra.mxu1 %v3224_v43 }
  0x38   : > { %488 = vmatprep.subr.bf16.mxu0 %v3236_v44  ;;  %873 = vmatprep.subr.bf16.mxu1 %v3243_v45 }
  0x3b   : > { %489 = vmatpush1.bf16.msra.mxu0 %v3252_v48  ;;  %874 = vmatpush1.bf16.msra.mxu1 %v3257_v49 }
  0x3c   : > { %490 = vmatprep.subr.bf16.mxu0 %v3264_v51  ;;  %875 = vmatprep.subr.bf16.mxu1 %v3269_v52 }
  0x3f   : > { %491 = vmatpush1.bf16.msra.mxu0 %v3276_v53  ;;  %876 = vmatpush1.bf16.msra.mxu1 %v3281_v54 }
  0x40   : > { %492 = vmatprep.subr.bf16.mxu0 %v3288_v55  ;;  %877 = vmatprep.subr.bf16.mxu1 %v3293_v56 }
  0x43   : > { %493 = vmatpush1.bf16.msra.mxu0 %v3300_v57  ;;  %878 = vmatpush1.bf16.msra.mxu1 %v3305_v58  ;;  %v183_v58 = vld [vmem:[%s3229_s13 + $0x28] sm:$0xff]  ;;  %v185_v57 = vld [vmem:[%s3229_s13 + $0x38] sm:$0xff] }
  0x44   : > { %494 = vmatprep.subr.bf16.mxu0 %v3312_v59  ;;  %879 = vmatprep.subr.bf16.mxu1 %v3317_v60  ;;  %v178_v60 = vld [vmem:[%s3229_s13] sm:$0xff]  ;;  %v180_v59 = vld [vmem:[%s3229_s13 + $0x10] sm:$0xff] }
  0x47   : > { %495 = vmatpush1.bf16.msra.mxu0 %v3324_v61  ;;  %880 = vmatpush1.bf16.msra.mxu1 %v3329_v62  ;;  %v242_v61 = vpack.c.bf16 %v180_v59, %v178_v60  ;;  %v245_v62 = vpack.c.bf16 %v185_v57, %v183_v58  ;;  %v187_v59 = vld [vmem:[%s3229_s13 + $0x48] sm:$0xff]  ;;  %v189_v60 = vld [vmem:[%s3229_s13 + $0x58] sm:$0xff] }
  0x48   : > { %496 = vmatprep.subr.bf16.mxu0 %v3336_v63  ;;  %881 = vmatprep.subr.bf16.mxu1 %v3341_v46  ;;  %v182_v46 = vld [vmem:[%s3229_s13 + $0x20] sm:$0xff]  ;;  %v184_v63 = vld [vmem:[%s3229_s13 + $0x30] sm:$0xff]  ;;  %v219_v57 = vld [vmem:[%s3229_s13 + $0x148] sm:$0xff] }
  0x49   : > { %v221_v58 = vld [vmem:[%s3229_s13 + $0x158] sm:$0xff] }
  0x4b   : > { %497 = vmatpush1.bf16.msra.mxu0 %v3346_v47  ;;  %882 = vmatpush1.bf16.msra.mxu1 %v3353_v50 }
  0x4c   : > { %1691 = vmatprep.subr.bf16.mxu0 %v2966_v0  ;;  %2076 = vmatprep.subr.bf16.mxu1 %v2971_v1  ;;  %v244_v0 = vpack.c.bf16 %v184_v63, %v182_v46  ;;  %v247_v1 = vpack.c.bf16 %v189_v60, %v187_v59  ;;  %v218_v63 = vld [vmem:[%s3229_s13 + $0x140] sm:$0xff]  ;;  %v220_v46 = vld [vmem:[%s3229_s13 + $0x150] sm:$0xff] }
  0x4d   : > { %v262_v59 = vpack.c.bf16 %v220_v46, %v218_v63 }
  0x4e   : > { %499 = vmatmul.mubr.bf16.vlgmr.msra.gmra.mrb[0].mxu0 %v242_v61  ;;  %884 = vmatmul.mubr.bf16.vlgmr.msra.gmra.mrb[0].mxu1 %v242_v61 }
  0x4f   : > { %1692 = vmatpush1.bf16.msra.mxu0 %v2977_v2  ;;  %2077 = vmatpush1.bf16.msra.mxu1 %v2982_v3  ;;  %v186_v2 = vld [vmem:[%s3229_s13 + $0x40] sm:$0xff]  ;;  %v188_v3 = vld [vmem:[%s3229_s13 + $0x50] sm:$0xff] }
  0x50   : > { %508 = vmatprep.mubr.bf16.mxu0 %v245_v62  ;;  %893 = vmatprep.mubr.bf16.mxu1 %v245_v62  ;;  %v263_v62 = vpack.c.bf16 %v221_v58, %v219_v57  ;;  %v1419_v57 = vld [vmem:[%s3229_s13 + $0x280] sm:$0xff]  ;;  %v1421_v58 = vld [vmem:[%s3229_s13 + $0x290] sm:$0xff] }
  0x51   : > { %1693 = vmatprep.subr.bf16.mxu0 %v2988_v4  ;;  %2078 = vmatprep.subr.bf16.mxu1 %v2995_v5  ;;  %v191_v4 = vld [vmem:[%s3229_s13 + $0x68] sm:$0xff]  ;;  %v193_v5 = vld [vmem:[%s3229_s13 + $0x78] sm:$0xff]  ;;  %v1475_v63 = vpack.c.bf16 %v1421_v58, %v1419_v57 }
  0x52   : > { %v1456_v57 = vld [vmem:[%s3229_s13 + $0x3a8] sm:$0xff]  ;;  %v1458_v58 = vld [vmem:[%s3229_s13 + $0x3b8] sm:$0xff] }
  0x53   : > { %1694 = vmatpush1.bf16.msra.mxu0 %v3000_v6  ;;  %2079 = vmatpush1.bf16.msra.mxu1 %v3006_v7  ;;  %v246_v6 = vpack.c.bf16 %v188_v3, %v186_v2  ;;  %v249_v7 = vpack.c.bf16 %v193_v5, %v191_v4  ;;  %v227_v2 = vld [vmem:[%s3229_s13 + $0x188] sm:$0xff]  ;;  %v229_v3 = vld [vmem:[%s3229_s13 + $0x198] sm:$0xff] }
  0x54   : > { %1695 = vmatprep.subr.bf16.mxu0 %v3012_v8  ;;  %2080 = vmatprep.subr.bf16.mxu1 %v3017_v9  ;;  %v190_v8 = vld [vmem:[%s3229_s13 + $0x60] sm:$0xff]  ;;  %v192_v9 = vld [vmem:[%s3229_s13 + $0x70] sm:$0xff]  ;;  %v267_v5 = vpack.c.bf16 %v229_v3, %v227_v2 }
  0x55   : > { %v1427_v2 = vld [vmem:[%s3229_s13 + $0x2c0] sm:$0xff]  ;;  %v1429_v3 = vld [vmem:[%s3229_s13 + $0x2d0] sm:$0xff] }
  0x56   : > { %509 = vmatmul.mubr.bf16.gmra.mrb[4].mxu0 %v244_v0  ;;  %894 = vmatmul.mubr.bf16.gmra.mrb[4].mxu1 %v244_v0  ;;  %v222_v0 = vld [vmem:[%s3229_s13 + $0x160] sm:$0xff] }
  0x57   : > { %518 = vmatprep.mubr.bf16.mxu0 %v247_v1  ;;  %903 = vmatprep.mubr.bf16.mxu1 %v247_v1  ;;  %v224_v1 = vld [vmem:[%s3229_s13 + $0x170] sm:$0xff] }
  0x58   : > { %1696 = vmatpush1.bf16.msra.mxu0 %v3022_v10  ;;  %2081 = vmatpush1.bf16.msra.mxu1 %v3027_v11  ;;  %v195_v10 = vld [vmem:[%s3229_s13 + $0x88] sm:$0xff]  ;;  %v197_v11 = vld [vmem:[%s3229_s13 + $0x98] sm:$0xff]  ;;  %v264_v4 = vpack.c.bf16 %v224_v1, %v222_v0 }
  0x59   : > { %1697 = vmatprep.subr.bf16.mxu0 %v3034_v12  ;;  %2082 = vmatprep.subr.bf16.mxu1 %v3041_v13  ;;  %v248_v12 = vpack.c.bf16 %v192_v9, %v190_v8  ;;  %v251_v13 = vpack.c.bf16 %v197_v11, %v195_v10  ;;  %v231_v8 = vld [vmem:[%s3229_s13 + $0x1a8] sm:$0xff]  ;;  %v233_v9 = vld [vmem:[%s3229_s13 + $0x1b8] sm:$0xff] }
  0x5a   : > { %v269_v11 = vpack.c.bf16 %v233_v9, %v231_v8  ;;  %v1431_v8 = vld [vmem:[%s3229_s13 + $0x2e0] sm:$0xff]  ;;  %v1433_v9 = vld [vmem:[%s3229_s13 + $0x2f0] sm:$0xff] }
  0x5c   : > { %1698 = vmatpush1.bf16.msra.mxu0 %v3046_v14  ;;  %2083 = vmatpush1.bf16.msra.mxu1 %v3053_v15  ;;  %v194_v14 = vld [vmem:[%s3229_s13 + $0x80] sm:$0xff]  ;;  %v196_v15 = vld [vmem:[%s3229_s13 + $0x90] sm:$0xff] }
  0x5d   : > { %1699 = vmatprep.subr.bf16.mxu0 %v3058_v16  ;;  %2084 = vmatprep.subr.bf16.mxu1 %v3065_v17  ;;  %v199_v16 = vld [vmem:[%s3229_s13 + $0xa8] sm:$0xff]  ;;  %v201_v17 = vld [vmem:[%s3229_s13 + $0xb8] sm:$0xff] }
  0x5e   : > { %519 = vmatmul.mubr.bf16.gmra.mrb[8].mxu0 %v246_v6  ;;  %904 = vmatmul.mubr.bf16.gmra.mrb[8].mxu1 %v246_v6  ;;  %v226_v6 = vld [vmem:[%s3229_s13 + $0x180] sm:$0xff] }
  0x5f   : > { %528 = vmatprep.mubr.bf16.mxu0 %v249_v7  ;;  %913 = vmatprep.mubr.bf16.mxu1 %v249_v7  ;;  %v228_v7 = vld [vmem:[%s3229_s13 + $0x190] sm:$0xff] }
  0x60   : > { %1700 = vmatpush1.bf16.msra.mxu0 %v3070_v18  ;;  %2085 = vmatpush1.bf16.msra.mxu1 %v3075_v19  ;;  %v250_v18 = vpack.c.bf16 %v196_v15, %v194_v14  ;;  %v253_v19 = vpack.c.bf16 %v201_v17, %v199_v16  ;;  %v266_v10 = vpack.c.bf16 %v228_v7, %v226_v6  ;;  %v235_v14 = vld [vmem:[%s3229_s13 + $0x1c8] sm:$0xff]  ;;  %v237_v15 = vld [vmem:[%s3229_s13 + $0x1d8] sm:$0xff] }
  0x61   : > { %1701 = vmatprep.subr.bf16.mxu0 %v3082_v20  ;;  %2086 = vmatprep.subr.bf16.mxu1 %v3089_v21  ;;  %v198_v20 = vld [vmem:[%s3229_s13 + $0xa0] sm:$0xff]  ;;  %v200_v21 = vld [vmem:[%s3229_s13 + $0xb0] sm:$0xff]  ;;  %v271_v17 = vpack.c.bf16 %v237_v15, %v235_v14  ;;  %v1479_v6 = vpack.c.bf16 %v1429_v3, %v1427_v2 }
  0x62   : > { %v1435_v14 = vld [vmem:[%s3229_s13 + $0x300] sm:$0xff]  ;;  %v1437_v15 = vld [vmem:[%s3229_s13 + $0x310] sm:$0xff] }
  0x64   : > { %1702 = vmatpush1.bf16.msra.mxu0 %v3094_v22  ;;  %2087 = vmatpush1.bf16.msra.mxu1 %v3101_v23  ;;  %v203_v22 = vld [vmem:[%s3229_s13 + $0xc8] sm:$0xff]  ;;  %v205_v23 = vld [vmem:[%s3229_s13 + $0xd8] sm:$0xff] }
  0x65   : > { %1703 = vmatprep.subr.bf16.mxu0 %v3106_v24  ;;  %2088 = vmatprep.subr.bf16.mxu1 %v3113_v25  ;;  %v252_v24 = vpack.c.bf16 %v200_v21, %v198_v20  ;;  %v255_v25 = vpack.c.bf16 %v205_v23, %v203_v22  ;;  %v239_v20 = vld [vmem:[%s3229_s13 + $0x1e8] sm:$0xff]  ;;  %v241_v21 = vld [vmem:[%s3229_s13 + $0x1f8] sm:$0xff] }
  0x66   : > { %529 = vmatmul.mubr.bf16.gmra.mrb[12].mxu0 %v248_v12  ;;  %914 = vmatmul.mubr.bf16.gmra.mrb[12].mxu1 %v248_v12  ;;  %v230_v12 = vld [vmem:[%s3229_s13 + $0x1a0] sm:$0xff]  ;;  %v273_v23 = vpack.c.bf16 %v241_v21, %v239_v20  ;;  %v1441_v21 = vld [vmem:[%s3229_s13 + $0x330] sm:$0xff] }
  0x67   : > { %538 = vmatprep.mubr.bf16.mxu0 %v251_v13  ;;  %923 = vmatprep.mubr.bf16.mxu1 %v251_v13  ;;  %v232_v13 = vld [vmem:[%s3229_s13 + $0x1b0] sm:$0xff]  ;;  %v1439_v20 = vld [vmem:[%s3229_s13 + $0x320] sm:$0xff] }
  0x68   : > { %1704 = vmatpush1.bf16.msra.mxu0 %v3118_v26  ;;  %2089 = vmatpush1.bf16.msra.mxu1 %v3123_v27  ;;  %v202_v26 = vld [vmem:[%s3229_s13 + $0xc0] sm:$0xff]  ;;  %v204_v27 = vld [vmem:[%s3229_s13 + $0xd0] sm:$0xff]  ;;  %v268_v16 = vpack.c.bf16 %v232_v13, %v230_v12  ;;  %v1481_v12 = vpack.c.bf16 %v1433_v9, %v1431_v8 }
  0x69   : > { %1705 = vmatprep.subr.bf16.mxu0 %v3130_v28  ;;  %2090 = vmatprep.subr.bf16.mxu1 %v3137_v29  ;;  %v207_v28 = vld [vmem:[%s3229_s13 + $0xe8] sm:$0xff]  ;;  %v209_v29 = vld [vmem:[%s3229_s13 + $0xf8] sm:$0xff]  ;;  %v1455_v8 = vld [vmem:[%s3229_s13 + $0x3a0] sm:$0xff] }
  0x6a   : > { %v1457_v9 = vld [vmem:[%s3229_s13 + $0x3b0] sm:$0xff] }
  0x6c   : > { %1706 = vmatpush1.bf16.msra.mxu0 %v3144_v30  ;;  %2091 = vmatpush1.bf16.msra.mxu1 %v3151_v31  ;;  %v254_v30 = vpack.c.bf16 %v204_v27, %v202_v26  ;;  %v257_v31 = vpack.c.bf16 %v209_v29, %v207_v28  ;;  %v1404_v26 = vld [vmem:[%s3229_s13 + $0x208] sm:$0xff]  ;;  %v1406_v27 = vld [vmem:[%s3229_s13 + $0x218] sm:$0xff] }
  0x6d   : > { %1707 = vmatprep.subr.bf16.mxu0 %v3156_v32  ;;  %2092 = vmatprep.subr.bf16.mxu1 %v3163_v33  ;;  %v206_v32 = vld [vmem:[%s3229_s13 + $0xe0] sm:$0xff]  ;;  %v208_v33 = vld [vmem:[%s3229_s13 + $0xf0] sm:$0xff]  ;;  %v1468_v29 = vpack.c.bf16 %v1406_v27, %v1404_v26 }
  0x6e   : > { %539 = vmatmul.mubr.bf16.gmra.mrb[16].mxu0 %v250_v18  ;;  %924 = vmatmul.mubr.bf16.gmra.mrb[16].mxu1 %v250_v18  ;;  %v234_v18 = vld [vmem:[%s3229_s13 + $0x1c0] sm:$0xff]  ;;  %v1445_v27 = vld [vmem:[%s3229_s13 + $0x350] sm:$0xff] }
  0x6f   : > { %548 = vmatprep.mubr.bf16.mxu0 %v253_v19  ;;  %933 = vmatprep.mubr.bf16.mxu1 %v253_v19  ;;  %v236_v19 = vld [vmem:[%s3229_s13 + $0x1d0] sm:$0xff]  ;;  %v1443_v26 = vld [vmem:[%s3229_s13 + $0x340] sm:$0xff] }
  0x70   : > { %1708 = vmatpush1.bf16.msra.mxu0 %v3168_v34  ;;  %2093 = vmatpush1.bf16.msra.mxu1 %v3173_v35  ;;  %v211_v34 = vld [vmem:[%s3229_s13 + $0x108] sm:$0xff]  ;;  %v213_v35 = vld [vmem:[%s3229_s13 + $0x118] sm:$0xff]  ;;  %v270_v22 = vpack.c.bf16 %v236_v19, %v234_v18  ;;  %v1483_v18 = vpack.c.bf16 %v1437_v15, %v1435_v14 }
  0x71   : > { %1709 = vmatprep.subr.bf16.mxu0 %v3180_v36  ;;  %2094 = vmatprep.subr.bf16.mxu1 %v3189_v37  ;;  %v256_v36 = vpack.c.bf16 %v208_v33, %v206_v32  ;;  %v259_v37 = vpack.c.bf16 %v213_v35, %v211_v34  ;;  %v1408_v32 = vld [vmem:[%s3229_s13 + $0x228] sm:$0xff]  ;;  %v1410_v33 = vld [vmem:[%s3229_s13 + $0x238] sm:$0xff] }
  0x72   : > { %v1470_v35 = vpack.c.bf16 %v1410_v33, %v1408_v32  ;;  %v1447_v32 = vld [vmem:[%s3229_s13 + $0x360] sm:$0xff]  ;;  %v1449_v33 = vld [vmem:[%s3229_s13 + $0x370] sm:$0xff] }
  0x74   : > { %1710 = vmatpush1.bf16.msra.mxu0 %v3194_v38  ;;  %2095 = vmatpush1.bf16.msra.mxu1 %v3201_v39  ;;  %v4427_v38 = vld [vmem:[#allocation2_spill] sm:$0xff]  ;;  %v4428_v39 = vld [vmem:[#allocation3_spill] sm:$0xff] }
  0x75   : > { %1711 = vmatprep.subr.bf16.mxu0 %v3206_v40  ;;  %2096 = vmatprep.subr.bf16.mxu1 %v3214_v41  ;;  %v4429_v40 = vld [vmem:[#allocation4_spill] sm:$0xff]  ;;  %v4430_v41 = vld [vmem:[#allocation5_spill] sm:$0xff] }
  0x76   : > { %549 = vmatmul.mubr.bf16.gmra.mrb[20].mxu0 %v252_v24  ;;  %934 = vmatmul.mubr.bf16.gmra.mrb[20].mxu1 %v252_v24  ;;  %v238_v24 = vld [vmem:[%s3229_s13 + $0x1e0] sm:$0xff] }
  0x77   : > { %558 = vmatprep.mubr.bf16.mxu0 %v255_v25  ;;  %943 = vmatprep.mubr.bf16.mxu1 %v255_v25  ;;  %v240_v25 = vld [vmem:[%s3229_s13 + $0x1f0] sm:$0xff] }
  0x78   : > { %1712 = vmatpush1.bf16.msra.mxu0 %v3219_v42  ;;  %2097 = vmatpush1.bf16.msra.mxu1 %v3224_v43  ;;  %v210_v42 = vld [vmem:[%s3229_s13 + $0x100] sm:$0xff]  ;;  %v212_v43 = vld [vmem:[%s3229_s13 + $0x110] sm:$0xff]  ;;  %v272_v28 = vpack.c.bf16 %v240_v25, %v238_v24  ;;  %v1485_v24 = vpack.c.bf16 %v1441_v21, %v1439_v20 }
  0x79   : > { %1713 = vmatprep.subr.bf16.mxu0 %v3236_v44  ;;  %2098 = vmatprep.subr.bf16.mxu1 %v3243_v45  ;;  %v215_v44 = vld [vmem:[%s3229_s13 + $0x128] sm:$0xff]  ;;  %v217_v45 = vld [vmem:[%s3229_s13 + $0x138] sm:$0xff] }
  0x7c   : > { %1714 = vmatpush1.bf16.msra.mxu0 %v3252_v48  ;;  %2099 = vmatpush1.bf16.msra.mxu1 %v3257_v49  ;;  %v4431_v48 = vld [vmem:[#allocation6_spill] sm:$0xff]  ;;  %v4432_v49 = vld [vmem:[#allocation7_spill] sm:$0xff] }
  0x7d   : > { %1715 = vmatprep.subr.bf16.mxu0 %v3264_v51  ;;  %2100 = vmatprep.subr.bf16.mxu1 %v3269_v52  ;;  %v4433_v51 = vld [vmem:[#allocation8_spill] sm:$0xff]  ;;  %v4434_v52 = vld [vmem:[#allocation9_spill] sm:$0xff] }
  0x7e   : > { %559 = vmatmul.mubr.bf16.gmra.mrb[24].mxu0 %v254_v30  ;;  %944 = vmatmul.mubr.bf16.gmra.mrb[24].mxu1 %v254_v30  ;;  %v1403_v30 = vld [vmem:[%s3229_s13 + $0x200] sm:$0xff] }
  0x7f   : > { %568 = vmatprep.mubr.bf16.mxu0 %v257_v31  ;;  %953 = vmatprep.mubr.bf16.mxu1 %v257_v31  ;;  %v1405_v31 = vld [vmem:[%s3229_s13 + $0x210] sm:$0xff] }
  0x80   : > { %1716 = vmatpush1.bf16.msra.mxu0 %v3276_v53  ;;  %2101 = vmatpush1.bf16.msra.mxu1 %v3281_v54  ;;  %v258_v53 = vpack.c.bf16 %v212_v43, %v210_v42  ;;  %v261_v54 = vpack.c.bf16 %v217_v45, %v215_v44  ;;  %v1467_v34 = vpack.c.bf16 %v1405_v31, %v1403_v30  ;;  %v1411_v42 = vld [vmem:[%s3229_s13 + $0x240] sm:$0xff]  ;;  %v1413_v43 = vld [vmem:[%s3229_s13 + $0x250] sm:$0xff]  ;;  %v1416_v44 = vld [vmem:[%s3229_s13 + $0x268] sm:$0xff] }
  0x81   : > { %1717 = vmatprep.subr.bf16.mxu0 %v3288_v55  ;;  %2102 = vmatprep.subr.bf16.mxu1 %v3293_v56  ;;  %v214_v55 = vld [vmem:[%s3229_s13 + $0x120] sm:$0xff]  ;;  %v216_v56 = vld [vmem:[%s3229_s13 + $0x130] sm:$0xff]  ;;  %v1418_v45 = vld [vmem:[%s3229_s13 + $0x278] sm:$0xff]  ;;  %v1487_v30 = vpack.c.bf16 %v1445_v27, %v1443_v26 }
  0x82   : > { %v260_v61 = vpack.c.bf16 %v216_v56, %v214_v55 }
  0x84   : > { %1718 = vmatpush1.bf16.msra.mxu0 %v4427_v38  ;;  %2103 = vmatpush1.bf16.msra.mxu1 %v4428_v39  ;;  %v1412_v38 = vld [vmem:[%s3229_s13 + $0x248] sm:$0xff]  ;;  %v1414_v39 = vld [vmem:[%s3229_s13 + $0x258] sm:$0xff] }
  0x85   : > { %1719 = vmatprep.subr.bf16.mxu0 %v4429_v40  ;;  %2104 = vmatprep.subr.bf16.mxu1 %v4430_v41  ;;  %v1472_v41 = vpack.c.bf16 %v1414_v39, %v1412_v38 }
  0x86   : > { %569 = vmatmul.mubr.bf16.gmra.mrb[28].mxu0 %v256_v36  ;;  %954 = vmatmul.mubr.bf16.gmra.mrb[28].mxu1 %v256_v36  ;;  %v1407_v36 = vld [vmem:[%s3229_s13 + $0x220] sm:$0xff] }
  0x87   : > { %578 = vmatprep.mubr.bf16.mxu0 %v259_v37  ;;  %963 = vmatprep.mubr.bf16.mxu1 %v259_v37  ;;  %v1409_v37 = vld [vmem:[%s3229_s13 + $0x230] sm:$0xff] }
  0x88   : > { %1720 = vmatpush1.bf16.msra.mxu0 %v4431_v48  ;;  %2105 = vmatpush1.bf16.msra.mxu1 %v4432_v49  ;;  %v1469_v40 = vpack.c.bf16 %v1409_v37, %v1407_v36  ;;  %v1471_v48 = vpack.c.bf16 %v1413_v43, %v1411_v42  ;;  %v1474_v49 = vpack.c.bf16 %v1418_v45, %v1416_v44 }
  0x89   : > { %1721 = vmatprep.subr.bf16.mxu0 %v4433_v51  ;;  %2106 = vmatprep.subr.bf16.mxu1 %v4434_v52  ;;  %v1415_v51 = vld [vmem:[%s3229_s13 + $0x260] sm:$0xff]  ;;  %v1417_v52 = vld [vmem:[%s3229_s13 + $0x270] sm:$0xff] }
  0x8a   : > { %v1473_v55 = vpack.c.bf16 %v1417_v52, %v1415_v51 }
  0x8c   : > { %1722 = vmatpush1.bf16.msra.mxu0 %v3346_v47  ;;  %2107 = vmatpush1.bf16.msra.mxu1 %v3353_v50  ;;  %v223_v47 = vld [vmem:[%s3229_s13 + $0x168] sm:$0xff]  ;;  %v225_v50 = vld [vmem:[%s3229_s13 + $0x178] sm:$0xff] }
  0x8d   : > { %v265_v60 = vpack.c.bf16 %v225_v50, %v223_v47  ;;  %v1423_v47 = vld [vmem:[%s3229_s13 + $0x2a0] sm:$0xff]  ;;  %v1425_v50 = vld [vmem:[%s3229_s13 + $0x2b0] sm:$0xff] }
  0x8e   : > { %579 = vmatmul.mubr.bf16.gmra.mrb[32].mxu0 %v258_v53  ;;  %964 = vmatmul.mubr.bf16.gmra.mrb[32].mxu1 %v258_v53  ;;  %v1420_v53 = vld [vmem:[%s3229_s13 + $0x288] sm:$0xff]  ;;  %v1477_v0 = vpack.c.bf16 %v1425_v50, %v1423_v47 }
  0x8f   : > { %588 = vmatprep.mubr.bf16.mxu0 %v261_v54  ;;  %973 = vmatprep.mubr.bf16.mxu1 %v261_v54  ;;  %v1422_v54 = vld [vmem:[%s3229_s13 + $0x298] sm:$0xff] }
  0x90   : > { %v1476_v56 = vpack.c.bf16 %v1422_v54, %v1420_v53 }
  0x96   : > { %589 = vmatmul.mubr.bf16.gmra.mrb[36].mxu0 %v260_v61  ;;  %974 = vmatmul.mubr.bf16.gmra.mrb[36].mxu1 %v260_v61  ;;  %v1424_v61 = vld [vmem:[%s3229_s13 + $0x2a8] sm:$0xff] }
  0x97   : > { %598 = vmatprep.mubr.bf16.mxu0 %v263_v62  ;;  %983 = vmatprep.mubr.bf16.mxu1 %v263_v62  ;;  %v1426_v62 = vld [vmem:[%s3229_s13 + $0x2b8] sm:$0xff] }
  0x98   : > { %v1478_v46 = vpack.c.bf16 %v1426_v62, %v1424_v61 }
  0x9e   : > { %599 = vmatmul.mubr.bf16.gmra.mrb[40].mxu0 %v262_v59  ;;  %984 = vmatmul.mubr.bf16.gmra.mrb[40].mxu1 %v262_v59  ;;  %v1428_v59 = vld [vmem:[%s3229_s13 + $0x2c8] sm:$0xff] }
  0x9f   : > { %608 = vmatprep.mubr.bf16.mxu0 %v265_v60  ;;  %993 = vmatprep.mubr.bf16.mxu1 %v265_v60  ;;  %v1430_v60 = vld [vmem:[%s3229_s13 + $0x2d8] sm:$0xff] }
  0xa0   : > { %v1480_v1 = vpack.c.bf16 %v1430_v60, %v1428_v59 }
  0xa6   : > { %609 = vmatmul.mubr.bf16.gmra.mrb[44].mxu0 %v264_v4  ;;  %994 = vmatmul.mubr.bf16.gmra.mrb[44].mxu1 %v264_v4  ;;  %v1432_v4 = vld [vmem:[%s3229_s13 + $0x2e8] sm:$0xff] }
  0xa7   : > { %618 = vmatprep.mubr.bf16.mxu0 %v267_v5  ;;  %1003 = vmatprep.mubr.bf16.mxu1 %v267_v5  ;;  %v1434_v5 = vld [vmem:[%s3229_s13 + $0x2f8] sm:$0xff] }
  0xa8   : > { %v1482_v7 = vpack.c.bf16 %v1434_v5, %v1432_v4 }
  0xae   : > { %619 = vmatmul.mubr.bf16.gmra.mrb[48].mxu0 %v266_v10  ;;  %1004 = vmatmul.mubr.bf16.gmra.mrb[48].mxu1 %v266_v10  ;;  %v1436_v10 = vld [vmem:[%s3229_s13 + $0x308] sm:$0xff] }
  0xaf   : > { %628 = vmatprep.mubr.bf16.mxu0 %v269_v11  ;;  %1013 = vmatprep.mubr.bf16.mxu1 %v269_v11  ;;  %v1438_v11 = vld [vmem:[%s3229_s13 + $0x318] sm:$0xff] }
  0xb0   : > { %v1484_v13 = vpack.c.bf16 %v1438_v11, %v1436_v10  ;;  %v1460_v10 = vld [vmem:[%s3229_s13 + $0x3c8] sm:$0xff]  ;;  %v1462_v11 = vld [vmem:[%s3229_s13 + $0x3d8] sm:$0xff] }
  0xb1   : > { %v1496_v21 = vpack.c.bf16 %v1462_v11, %v1460_v10 }
  0xb6   : > { %629 = vmatmul.mubr.bf16.gmra.mrb[52].mxu0 %v268_v16  ;;  %1014 = vmatmul.mubr.bf16.gmra.mrb[52].mxu1 %v268_v16  ;;  %v1440_v16 = vld [vmem:[%s3229_s13 + $0x328] sm:$0xff] }
  0xb7   : > { %638 = vmatprep.mubr.bf16.mxu0 %v271_v17  ;;  %1023 = vmatprep.mubr.bf16.mxu1 %v271_v17  ;;  %v1442_v17 = vld [vmem:[%s3229_s13 + $0x338] sm:$0xff] }
  0xb8   : > { %v1486_v19 = vpack.c.bf16 %v1442_v17, %v1440_v16  ;;  %v1493_v17 = vpack.c.bf16 %v1457_v9, %v1455_v8 }
  0xbe   : > { %639 = vmatmul.mubr.bf16.gmra.mrb[56].mxu0 %v270_v22  ;;  %1024 = vmatmul.mubr.bf16.gmra.mrb[56].mxu1 %v270_v22  ;;  %v1444_v22 = vld [vmem:[%s3229_s13 + $0x348] sm:$0xff] }
  0xbf   : > { %648 = vmatprep.mubr.bf16.mxu0 %v273_v23  ;;  %1033 = vmatprep.mubr.bf16.mxu1 %v273_v23  ;;  %v1446_v23 = vld [vmem:[%s3229_s13 + $0x358] sm:$0xff] }
  0xc0   : > { %v1488_v25 = vpack.c.bf16 %v1446_v23, %v1444_v22 }
  0xc6   : > { %649 = vmatmul.mubr.bf16.gmra.mrb[60].mxu0 %v272_v28  ;;  %1034 = vmatmul.mubr.bf16.gmra.mrb[60].mxu1 %v272_v28  ;;  %v1448_v28 = vld [vmem:[%s3229_s13 + $0x368] sm:$0xff] }
  0xc7   : > { %1723 = vmatprep.mubr.bf16.mxu0 %v1468_v29  ;;  %2108 = vmatprep.mubr.bf16.mxu1 %v1468_v29  ;;  %v1450_v29 = vld [vmem:[%s3229_s13 + $0x378] sm:$0xff] }
  0xc8   : > { %v1490_v31 = vpack.c.bf16 %v1450_v29, %v1448_v28  ;;  %v1459_v28 = vld [vmem:[%s3229_s13 + $0x3c0] sm:$0xff]  ;;  %v1461_v29 = vld [vmem:[%s3229_s13 + $0x3d0] sm:$0xff] }
  0xce   : > { %1724 = vmatmul.mubr.bf16.vlgmr.msra.gmra.mrb[64].mxu0 %v1467_v34  ;;  %2109 = vmatmul.mubr.bf16.vlgmr.msra.gmra.mrb[64].mxu1 %v1467_v34  ;;  %v1452_v34 = vld [vmem:[%s3229_s13 + $0x388] sm:$0xff] }
  0xcf   : > { %1733 = vmatprep.mubr.bf16.mxu0 %v1470_v35  ;;  %2118 = vmatprep.mubr.bf16.mxu1 %v1470_v35  ;;  %v1454_v35 = vld [vmem:[%s3229_s13 + $0x398] sm:$0xff] }
  0xd0   : > { %v1492_v45 = vpack.c.bf16 %v1454_v35, %v1452_v34 }
  0xd6   : > { %1734 = vmatmul.mubr.bf16.gmra.mrb[68].mxu0 %v1469_v40  ;;  %2119 = vmatmul.mubr.bf16.gmra.mrb[68].mxu1 %v1469_v40 }
  0xd7   : > { %1743 = vmatprep.mubr.bf16.mxu0 %v1472_v41  ;;  %2128 = vmatprep.mubr.bf16.mxu1 %v1472_v41  ;;  %v1489_v41 = vpack.c.bf16 %v1449_v33, %v1447_v32 }
  0xde   : > { %1744 = vmatmul.mubr.bf16.gmra.mrb[72].mxu0 %v1471_v48  ;;  %2129 = vmatmul.mubr.bf16.gmra.mrb[72].mxu1 %v1471_v48 }
  0xdf   : > { %1753 = vmatprep.mubr.bf16.mxu0 %v1474_v49  ;;  %2138 = vmatprep.mubr.bf16.mxu1 %v1474_v49 }
  0xe6   : > { %1754 = vmatmul.mubr.bf16.gmra.mrb[76].mxu0 %v1473_v55  ;;  %2139 = vmatmul.mubr.bf16.gmra.mrb[76].mxu1 %v1473_v55  ;;  %v1451_v55 = vld [vmem:[%s3229_s13 + $0x380] sm:$0xff] }
  0xe7   : > { %1763 = vmatprep.mubr.bf16.mxu0 %v1476_v56  ;;  %2148 = vmatprep.mubr.bf16.mxu1 %v1476_v56  ;;  %v1453_v56 = vld [vmem:[%s3229_s13 + $0x390] sm:$0xff] }
  0xe8   : > { %v1491_v50 = vpack.c.bf16 %v1453_v56, %v1451_v55 }
  0xee   : > { %1764 = vmatmul.mubr.bf16.gmra.mrb[80].mxu0 %v1475_v63  ;;  %2149 = vmatmul.mubr.bf16.gmra.mrb[80].mxu1 %v1475_v63 }
  0xef   : > { %1773 = vmatprep.mubr.bf16.mxu0 %v1478_v46  ;;  %2158 = vmatprep.mubr.bf16.mxu1 %v1478_v46 }
  0xf6   : > { %1774 = vmatmul.mubr.bf16.gmra.mrb[84].mxu0 %v1477_v0  ;;  %2159 = vmatmul.mubr.bf16.gmra.mrb[84].mxu1 %v1477_v0 }
  0xf7   : > { %1783 = vmatprep.mubr.bf16.mxu0 %v1480_v1  ;;  %2168 = vmatprep.mubr.bf16.mxu1 %v1480_v1  ;;  %v1494_v1 = vpack.c.bf16 %v1458_v58, %v1456_v57 }
  0xfe   : > { %1784 = vmatmul.mubr.bf16.gmra.mrb[88].mxu0 %v1479_v6  ;;  %2169 = vmatmul.mubr.bf16.gmra.mrb[88].mxu1 %v1479_v6 }
  0xff   : > { %1793 = vmatprep.mubr.bf16.mxu0 %v1482_v7  ;;  %2178 = vmatprep.mubr.bf16.mxu1 %v1482_v7 }
 0x106   : > { %1794 = vmatmul.mubr.bf16.gmra.mrb[92].mxu0 %v1481_v12  ;;  %2179 = vmatmul.mubr.bf16.gmra.mrb[92].mxu1 %v1481_v12 }
 0x107   : > { %1803 = vmatprep.mubr.bf16.mxu0 %v1484_v13  ;;  %2188 = vmatprep.mubr.bf16.mxu1 %v1484_v13 }
 0x10e   : > { %1804 = vmatmul.mubr.bf16.gmra.mrb[96].mxu0 %v1483_v18  ;;  %2189 = vmatmul.mubr.bf16.gmra.mrb[96].mxu1 %v1483_v18 }
 0x10f   : > { %1813 = vmatprep.mubr.bf16.mxu0 %v1486_v19  ;;  %2198 = vmatprep.mubr.bf16.mxu1 %v1486_v19 }
 0x116   : > { %1814 = vmatmul.mubr.bf16.gmra.mrb[100].mxu0 %v1485_v24  ;;  %2199 = vmatmul.mubr.bf16.gmra.mrb[100].mxu1 %v1485_v24 }
 0x117   : > { %1823 = vmatprep.mubr.bf16.mxu0 %v1488_v25  ;;  %2208 = vmatprep.mubr.bf16.mxu1 %v1488_v25 }
 0x11e   : > { %1824 = vmatmul.mubr.bf16.gmra.mrb[104].mxu0 %v1487_v30  ;;  %2209 = vmatmul.mubr.bf16.gmra.mrb[104].mxu1 %v1487_v30  ;;  %v1464_v30 = vld [vmem:[%s3229_s13 + $0x3e8] sm:$0xff] }
 0x11f   : > { %1833 = vmatprep.mubr.bf16.mxu0 %v1490_v31  ;;  %2218 = vmatprep.mubr.bf16.mxu1 %v1490_v31  ;;  %v1466_v31 = vld [vmem:[%s3229_s13 + $0x3f8] sm:$0xff] }
 0x121   : > { %v500_v36 = vpop.f32.mrb[0].mxu0  ;;  %v885_v37 = vpop.f32.mrb[0].mxu1 }
 0x122   : > { %v1044_v38 = vmax.f32 %v500_v36, %v885_v37  ;;  %v502_v39 = vpop.f32.mrb[1].mxu0  ;;  %v887_v40 = vpop.f32.mrb[1].mxu1  ;;  %v1495_v37 = vpack.c.bf16 %v1461_v29, %v1459_v28 }
 0x123   : > { %v1045_v42 = vmax.f32 %v502_v39, %v887_v40  ;;  %v504_v43 = vpop.f32.mrb[2].mxu0  ;;  %v889_v44 = vpop.f32.mrb[2].mxu1 }
 0x124   : > { %v1046_v48 = vmax.f32 %v504_v43, %v889_v44  ;;  %v506_v49 = vpop.f32.mrb[3].mxu0  ;;  %v891_v51 = vpop.f32.mrb[3].mxu1 }
 0x125   : > { %v1047_v52 = vmax.f32 %v506_v49, %v891_v51  ;;  %v3535_v53 = vmax.f32 %v1044_v38, %v1045_v42  ;;  %v1463_v51 = vld [vmem:[%s3229_s13 + $0x3e0] sm:$0xff] }
 0x126   : > { %1834 = vmatmul.mubr.bf16.gmra.mrb[108].mxu0 %v1489_v41  ;;  %2219 = vmatmul.mubr.bf16.gmra.mrb[108].mxu1 %v1489_v41  ;;  %v1498_v41 = vpack.c.bf16 %v1466_v31, %v1464_v30 }
 0x127   : > { %v3537_v54 = vmax.f32 %v1046_v48, %v1047_v52  ;;  %1140 = vrot.lane.b32.xlu0 %v3535_v53, %s2933_s22  ;;  %1843 = vmatprep.mubr.bf16.mxu0 %v1492_v45  ;;  %v1465_v52 = vld [vmem:[%s3229_s13 + $0x3f0] sm:$0xff]  ;;  %s2934_s13 = smov 32  }
 0x128   : > { %2228 = vmatprep.mubr.bf16.mxu1 %v1492_v45 }
 0x129   : > { %v510_v61 = vpop.f32.mrb[4].mxu0  ;;  %v895_v62 = vpop.f32.mrb[4].mxu1 }
 0x12a   : > { %v1048_v63 = vmax.f32 %v510_v61, %v895_v62  ;;  %v512_v46 = vpop.f32.mrb[5].mxu0  ;;  %v897_v47 = vpop.f32.mrb[5].mxu1  ;;  %v1497_v62 = vpack.c.bf16 %v1465_v52, %v1463_v51 }
 0x12b   : > { %v1049_v59 = vmax.f32 %v512_v46, %v897_v47  ;;  %v899_v60 = vpop.f32.mrb[6].mxu1  ;;  %1142 = vrot.lane.b32.xlu0 %v3537_v54, %s2933_s22  ;;  %v514_v0 = vpop.f32.mrb[6].mxu0 }
 0x12c   : > { %v1050_v2 = vmax.f32 %v514_v0, %v899_v60  ;;  %v516_v3 = vpop.f32.mrb[7].mxu0  ;;  %v901_v4 = vpop.f32.mrb[7].mxu1 }
 0x12d   : > { %v1051_v5 = vmax.f32 %v516_v3, %v901_v4  ;;  %v3547_v6 = vmax.f32 %v1048_v63, %v1049_v59 }
 0x12e   : > { %1844 = vmatmul.mubr.bf16.gmra.mrb[112].mxu0 %v1491_v50  ;;  %2229 = vmatmul.mubr.bf16.gmra.mrb[112].mxu1 %v1491_v50 }
 0x12f   : > { %v3549_v7 = vmax.f32 %v1050_v2, %v1051_v5  ;;  %1144 = vrot.lane.b32.xlu1 %v3547_v6, %s2933_s22  ;;  %1853 = vmatprep.mubr.bf16.mxu0 %v1494_v1 }
 0x130   : > { %2238 = vmatprep.mubr.bf16.mxu1 %v1494_v1 }
 0x131   : > { %v520_v12 = vpop.f32.mrb[8].mxu0  ;;  %v905_v13 = vpop.f32.mrb[8].mxu1 }
 0x132   : > { %v1052_v14 = vmax.f32 %v520_v12, %v905_v13  ;;  %v522_v15 = vpop.f32.mrb[9].mxu0  ;;  %v907_v16 = vpop.f32.mrb[9].mxu1 }
 0x133   : > { %v1053_v18 = vmax.f32 %v522_v15, %v907_v16  ;;  %v909_v19 = vpop.f32.mrb[10].mxu1  ;;  %1146 = vrot.lane.b32.xlu1 %v3549_v7, %s2933_s22  ;;  %v524_v20 = vpop.f32.mrb[10].mxu0 }
 0x134   : > { %v1054_v22 = vmax.f32 %v524_v20, %v909_v19  ;;  %v526_v23 = vpop.f32.mrb[11].mxu0  ;;  %v911_v24 = vpop.f32.mrb[11].mxu1 }
 0x135   : > { %v3559_v25 = vmax.f32 %v1052_v14, %v1053_v18  ;;  %v1055_v26 = vmax.f32 %v526_v23, %v911_v24 }
 0x136   : > { %1854 = vmatmul.mubr.bf16.gmra.mrb[116].mxu0 %v1493_v17  ;;  %2239 = vmatmul.mubr.bf16.gmra.mrb[116].mxu1 %v1493_v17 }
 0x137   : > { %v3561_v27 = vmax.f32 %v1054_v22, %v1055_v26  ;;  %1148 = vrot.lane.b32.xlu0 %v3559_v25, %s2933_s22  ;;  %1863 = vmatprep.mubr.bf16.mxu0 %v1496_v21 }
 0x138   : > { %2248 = vmatprep.mubr.bf16.mxu1 %v1496_v21 }
 0x139   : > { %v915_v32 = vpop.f32.mrb[12].mxu1  ;;  %1150 = vrot.lane.b32.xlu1 %v3561_v27, %s2933_s22  ;;  %v530_v33 = vpop.f32.mrb[12].mxu0 }
 0x13a   : > { %v1056_v34 = vmax.f32 %v530_v33, %v915_v32  ;;  %v532_v35 = vpop.f32.mrb[13].mxu0  ;;  %v917_v36 = vpop.f32.mrb[13].mxu1 }
 0x13b   : > { %v1057_v38 = vmax.f32 %v532_v35, %v917_v36  ;;  %v534_v39 = vpop.f32.mrb[14].mxu0  ;;  %v919_v40 = vpop.f32.mrb[14].mxu1 }
 0x13c   : > { %v1058_v42 = vmax.f32 %v534_v39, %v919_v40  ;;  %v536_v43 = vpop.f32.mrb[15].mxu0  ;;  %v921_v44 = vpop.f32.mrb[15].mxu1 }
 0x13d   : > { %v3571_v45 = vmax.f32 %v1056_v34, %v1057_v38  ;;  %v1059_v48 = vmax.f32 %v536_v43, %v921_v44 }
 0x13e   : > { %1864 = vmatmul.mubr.bf16.gmra.mrb[120].mxu0 %v1495_v37  ;;  %2249 = vmatmul.mubr.bf16.gmra.mrb[120].mxu1 %v1495_v37 }
 0x13f   : > { %v3573_v49 = vmax.f32 %v1058_v42, %v1059_v48  ;;  %1152 = vrot.lane.b32.xlu0 %v3571_v45, %s2933_s22  ;;  %1873 = vmatprep.mubr.bf16.mxu0 %v1498_v41 }
 0x140   : > { %2258 = vmatprep.mubr.bf16.mxu1 %v1498_v41 }
 0x141   : > { %v925_v55 = vpop.f32.mrb[16].mxu1  ;;  %1154 = vrot.lane.b32.xlu1 %v3573_v49, %s2933_s22  ;;  %v540_v56 = vpop.f32.mrb[16].mxu0 }
 0x142   : > { %v1060_v57 = vmax.f32 %v540_v56, %v925_v55  ;;  %v542_v58 = vpop.f32.mrb[17].mxu0  ;;  %v927_v61 = vpop.f32.mrb[17].mxu1 }
 0x143   : > { %v1061_v63 = vmax.f32 %v542_v58, %v927_v61  ;;  %v544_v46 = vpop.f32.mrb[18].mxu0  ;;  %v929_v47 = vpop.f32.mrb[18].mxu1 }
 0x144   : > { %v1062_v50 = vmax.f32 %v544_v46, %v929_v47  ;;  %v546_v59 = vpop.f32.mrb[19].mxu0  ;;  %v931_v60 = vpop.f32.mrb[19].mxu1 }
 0x145   : > { %v3581_v0 = vmax.f32 %v1060_v57, %v1061_v63  ;;  %v1063_v1 = vmax.f32 %v546_v59, %v931_v60 }
 0x146   : > { %1874 = vmatmul.mubr.bf16.gmra.mrb[124].mxu0 %v1497_v62  ;;  %2259 = vmatmul.mubr.bf16.gmra.mrb[124].mxu1 %v1497_v62 }
 0x147   : > { %v3583_v2 = vmax.f32 %v1062_v50, %v1063_v1  ;;  %1156 = vrot.lane.b32.xlu0 %v3581_v0, %s2933_s22 }
 0x149   : > { %v935_v3 = vpop.f32.mrb[20].mxu1  ;;  %1158 = vrot.lane.b32.xlu1 %v3583_v2, %s2933_s22  ;;  %v550_v4 = vpop.f32.mrb[20].mxu0 }
 0x14a   : > { %v1064_v5 = vmax.f32 %v550_v4, %v935_v3  ;;  %v552_v8 = vpop.f32.mrb[21].mxu0  ;;  %v937_v9 = vpop.f32.mrb[21].mxu1 }
 0x14b   : > { %v1065_v10 = vmax.f32 %v552_v8, %v937_v9  ;;  %v554_v11 = vpop.f32.mrb[22].mxu0  ;;  %v939_v12 = vpop.f32.mrb[22].mxu1 }
 0x14c   : > { %v1066_v13 = vmax.f32 %v554_v11, %v939_v12  ;;  %v556_v14 = vpop.f32.mrb[23].mxu0  ;;  %v941_v15 = vpop.f32.mrb[23].mxu1 }
 0x14d   : > { %v3589_v16 = vmax.f32 %v1064_v5, %v1065_v10  ;;  %v1067_v17 = vmax.f32 %v556_v14, %v941_v15 }
 0x14f   : > { %v3591_v18 = vmax.f32 %v1066_v13, %v1067_v17  ;;  %1160 = vrot.lane.b32.xlu0 %v3589_v16, %s2933_s22 }
 0x151   : > { %v945_v19 = vpop.f32.mrb[24].mxu1  ;;  %1162 = vrot.lane.b32.xlu1 %v3591_v18, %s2933_s22  ;;  %v560_v20 = vpop.f32.mrb[24].mxu0 }
 0x152   : > { %v1068_v21 = vmax.f32 %v560_v20, %v945_v19  ;;  %v562_v22 = vpop.f32.mrb[25].mxu0  ;;  %v947_v23 = vpop.f32.mrb[25].mxu1 }
 0x153   : > { %v1069_v24 = vmax.f32 %v562_v22, %v947_v23  ;;  %v564_v26 = vpop.f32.mrb[26].mxu0  ;;  %v949_v28 = vpop.f32.mrb[26].mxu1 }
 0x154   : > { %v1070_v29 = vmax.f32 %v564_v26, %v949_v28  ;;  %v566_v30 = vpop.f32.mrb[27].mxu0  ;;  %v951_v31 = vpop.f32.mrb[27].mxu1 }
 0x155   : > { %v3597_v32 = vmax.f32 %v1068_v21, %v1069_v24  ;;  %v1071_v33 = vmax.f32 %v566_v30, %v951_v31 }
 0x157   : > { %v3599_v34 = vmax.f32 %v1070_v29, %v1071_v33  ;;  %1164 = vrot.lane.b32.xlu0 %v3597_v32, %s2933_s22 }
 0x159   : > { %v955_v35 = vpop.f32.mrb[28].mxu1  ;;  %1166 = vrot.lane.b32.xlu1 %v3599_v34, %s2933_s22  ;;  %v570_v36 = vpop.f32.mrb[28].mxu0 }
 0x15a   : > { %v1072_v37 = vmax.f32 %v570_v36, %v955_v35  ;;  %v572_v38 = vpop.f32.mrb[29].mxu0  ;;  %v957_v39 = vpop.f32.mrb[29].mxu1 }
 0x15b   : > { %v1073_v40 = vmax.f32 %v572_v38, %v957_v39  ;;  %v574_v41 = vpop.f32.mrb[30].mxu0  ;;  %v959_v42 = vpop.f32.mrb[30].mxu1 }
 0x15c   : > { %v1074_v43 = vmax.f32 %v574_v41, %v959_v42  ;;  %v576_v44 = vpop.f32.mrb[31].mxu0  ;;  %v961_v48 = vpop.f32.mrb[31].mxu1 }
 0x15d   : > { %v3605_v51 = vmax.f32 %v1072_v37, %v1073_v40  ;;  %v1075_v52 = vmax.f32 %v576_v44, %v961_v48 }
 0x15f   : > { %v3607_v55 = vmax.f32 %v1074_v43, %v1075_v52  ;;  %1168 = vrot.lane.b32.xlu0 %v3605_v51, %s2933_s22 }
 0x161   : > { %v965_v56 = vpop.f32.mrb[32].mxu1  ;;  %1170 = vrot.lane.b32.xlu1 %v3607_v55, %s2933_s22  ;;  %v580_v57 = vpop.f32.mrb[32].mxu0 }
 0x162   : > { %v1076_v58 = vmax.f32 %v580_v57, %v965_v56  ;;  %v582_v61 = vpop.f32.mrb[33].mxu0  ;;  %v967_v62 = vpop.f32.mrb[33].mxu1 }
 0x163   : > { %v1077_v63 = vmax.f32 %v582_v61, %v967_v62  ;;  %v584_v46 = vpop.f32.mrb[34].mxu0  ;;  %v969_v47 = vpop.f32.mrb[34].mxu1 }
 0x164   : > { %v1078_v50 = vmax.f32 %v584_v46, %v969_v47  ;;  %v586_v59 = vpop.f32.mrb[35].mxu0  ;;  %v971_v60 = vpop.f32.mrb[35].mxu1 }
 0x165   : > { %v3613_v1 = vmax.f32 %v1076_v58, %v1077_v63  ;;  %v1079_v3 = vmax.f32 %v586_v59, %v971_v60 }
 0x167   : > { %v3615_v4 = vmax.f32 %v1078_v50, %v1079_v3  ;;  %1172 = vrot.lane.b32.xlu0 %v3613_v1, %s2933_s22 }
 0x169   : > { %v975_v5 = vpop.f32.mrb[36].mxu1  ;;  %1174 = vrot.lane.b32.xlu1 %v3615_v4, %s2933_s22  ;;  %v590_v8 = vpop.f32.mrb[36].mxu0 }
 0x16a   : > { %v1080_v9 = vmax.f32 %v590_v8, %v975_v5  ;;  %v592_v10 = vpop.f32.mrb[37].mxu0  ;;  %v977_v11 = vpop.f32.mrb[37].mxu1 }
 0x16b   : > { %v1081_v12 = vmax.f32 %v592_v10, %v977_v11  ;;  %v594_v13 = vpop.f32.mrb[38].mxu0  ;;  %v979_v14 = vpop.f32.mrb[38].mxu1 }
 0x16c   : > { %v1082_v15 = vmax.f32 %v594_v13, %v979_v14  ;;  %v596_v17 = vpop.f32.mrb[39].mxu0  ;;  %v981_v19 = vpop.f32.mrb[39].mxu1 }
 0x16d   : > { %v3621_v20 = vmax.f32 %v1080_v9, %v1081_v12  ;;  %v1083_v21 = vmax.f32 %v596_v17, %v981_v19 }
 0x16f   : > { %v3623_v22 = vmax.f32 %v1082_v15, %v1083_v21  ;;  %1176 = vrot.lane.b32.xlu0 %v3621_v20, %s2933_s22 }
 0x171   : > { %v985_v23 = vpop.f32.mrb[40].mxu1  ;;  %1178 = vrot.lane.b32.xlu1 %v3623_v22, %s2933_s22  ;;  %v600_v24 = vpop.f32.mrb[40].mxu0 }
 0x172   : > { %v1084_v26 = vmax.f32 %v600_v24, %v985_v23  ;;  %v602_v28 = vpop.f32.mrb[41].mxu0  ;;  %v987_v29 = vpop.f32.mrb[41].mxu1 }
 0x173   : > { %v1085_v30 = vmax.f32 %v602_v28, %v987_v29  ;;  %v604_v31 = vpop.f32.mrb[42].mxu0  ;;  %v989_v33 = vpop.f32.mrb[42].mxu1 }
 0x174   : > { %v1086_v35 = vmax.f32 %v604_v31, %v989_v33  ;;  %v606_v36 = vpop.f32.mrb[43].mxu0  ;;  %v991_v37 = vpop.f32.mrb[43].mxu1 }
 0x175   : > { %v3629_v38 = vmax.f32 %v1084_v26, %v1085_v30  ;;  %v1087_v39 = vmax.f32 %v606_v36, %v991_v37 }
 0x177   : > { %v3631_v40 = vmax.f32 %v1086_v35, %v1087_v39  ;;  %1180 = vrot.lane.b32.xlu0 %v3629_v38, %s2933_s22 }
 0x179   : > { %v995_v41 = vpop.f32.mrb[44].mxu1  ;;  %1182 = vrot.lane.b32.xlu1 %v3631_v40, %s2933_s22  ;;  %v610_v42 = vpop.f32.mrb[44].mxu0 }
 0x17a   : > { %v1088_v43 = vmax.f32 %v610_v42, %v995_v41  ;;  %v612_v44 = vpop.f32.mrb[45].mxu0  ;;  %v997_v48 = vpop.f32.mrb[45].mxu1 }
 0x17b   : > { %v1089_v52 = vmax.f32 %v612_v44, %v997_v48  ;;  %v614_v56 = vpop.f32.mrb[46].mxu0  ;;  %v999_v57 = vpop.f32.mrb[46].mxu1 }
 0x17c   : > { %v1090_v58 = vmax.f32 %v614_v56, %v999_v57  ;;  %v616_v61 = vpop.f32.mrb[47].mxu0  ;;  %v1001_v62 = vpop.f32.mrb[47].mxu1 }
 0x17d   : > { %v3637_v63 = vmax.f32 %v1088_v43, %v1089_v52  ;;  %v1091_v46 = vmax.f32 %v616_v61, %v1001_v62 }
 0x17f   : > { %v3639_v47 = vmax.f32 %v1090_v58, %v1091_v46  ;;  %1184 = vrot.lane.b32.xlu0 %v3637_v63, %s2933_s22 }
 0x181   : > { %v1005_v50 = vpop.f32.mrb[48].mxu1  ;;  %1186 = vrot.lane.b32.xlu1 %v3639_v47, %s2933_s22  ;;  %v620_v59 = vpop.f32.mrb[48].mxu0 }
 0x182   : > { %v1092_v60 = vmax.f32 %v620_v59, %v1005_v50  ;;  %v622_v3 = vpop.f32.mrb[49].mxu0  ;;  %v1007_v5 = vpop.f32.mrb[49].mxu1 }
 0x183   : > { %v1093_v8 = vmax.f32 %v622_v3, %v1007_v5  ;;  %v624_v9 = vpop.f32.mrb[50].mxu0  ;;  %v1009_v10 = vpop.f32.mrb[50].mxu1 }
 0x184   : > { %v1094_v11 = vmax.f32 %v624_v9, %v1009_v10  ;;  %v626_v12 = vpop.f32.mrb[51].mxu0  ;;  %v1011_v13 = vpop.f32.mrb[51].mxu1 }
 0x185   : > { %v3645_v14 = vmax.f32 %v1092_v60, %v1093_v8  ;;  %v1095_v15 = vmax.f32 %v626_v12, %v1011_v13 }
 0x187   : > { %v3647_v17 = vmax.f32 %v1094_v11, %v1095_v15  ;;  %1188 = vrot.lane.b32.xlu0 %v3645_v14, %s2933_s22 }
 0x189   : > { %v1015_v19 = vpop.f32.mrb[52].mxu1  ;;  %1190 = vrot.lane.b32.xlu1 %v3647_v17, %s2933_s22  ;;  %v630_v21 = vpop.f32.mrb[52].mxu0 }
 0x18a   : > { %v1096_v23 = vmax.f32 %v630_v21, %v1015_v19  ;;  %v632_v24 = vpop.f32.mrb[53].mxu0  ;;  %v1017_v26 = vpop.f32.mrb[53].mxu1 }
 0x18b   : > { %v1097_v28 = vmax.f32 %v632_v24, %v1017_v26  ;;  %v634_v29 = vpop.f32.mrb[54].mxu0  ;;  %v1019_v30 = vpop.f32.mrb[54].mxu1 }
 0x18c   : > { %v1098_v31 = vmax.f32 %v634_v29, %v1019_v30  ;;  %v636_v33 = vpop.f32.mrb[55].mxu0  ;;  %v1021_v35 = vpop.f32.mrb[55].mxu1 }
 0x18d   : > { %v3653_v36 = vmax.f32 %v1096_v23, %v1097_v28  ;;  %v1099_v37 = vmax.f32 %v636_v33, %v1021_v35 }
 0x18f   : > { %v3655_v39 = vmax.f32 %v1098_v31, %v1099_v37  ;;  %1192 = vrot.lane.b32.xlu0 %v3653_v36, %s2933_s22 }
 0x191   : > { %v1025_v41 = vpop.f32.mrb[56].mxu1  ;;  %1194 = vrot.lane.b32.xlu1 %v3655_v39, %s2933_s22  ;;  %v640_v42 = vpop.f32.mrb[56].mxu0 }
 0x192   : > { %v1100_v43 = vmax.f32 %v640_v42, %v1025_v41  ;;  %v642_v44 = vpop.f32.mrb[57].mxu0  ;;  %v1027_v48 = vpop.f32.mrb[57].mxu1 }
 0x193   : > { %v1101_v52 = vmax.f32 %v642_v44, %v1027_v48  ;;  %v644_v56 = vpop.f32.mrb[58].mxu0  ;;  %v1029_v57 = vpop.f32.mrb[58].mxu1 }
 0x194   : > { %v1102_v58 = vmax.f32 %v644_v56, %v1029_v57  ;;  %v646_v61 = vpop.f32.mrb[59].mxu0  ;;  %v1031_v62 = vpop.f32.mrb[59].mxu1 }
 0x195   : > { %v3661_v46 = vmax.f32 %v1100_v43, %v1101_v52  ;;  %v1103_v50 = vmax.f32 %v646_v61, %v1031_v62 }
 0x197   : > { %v3663_v59 = vmax.f32 %v1102_v58, %v1103_v50  ;;  %1196 = vrot.lane.b32.xlu0 %v3661_v46, %s2933_s22 }
 0x199   : > { %v1035_v60 = vpop.f32.mrb[60].mxu1  ;;  %v1141_v3 = vpop.permute.xlu0 %1140  ;;  %1198 = vrot.lane.b32.xlu1 %v3663_v59, %s2933_s22 }
 0x19a   : > { %v3670_v5 = vmax.f32 %v3535_v53, %v1141_v3  ;;  %v650_v8 = vpop.f32.mrb[60].mxu0  ;;  %v1037_v9 = vpop.f32.mrb[61].mxu1 }
 0x19b   : > { %v1104_v10 = vmax.f32 %v650_v8, %v1035_v60  ;;  %v652_v11 = vpop.f32.mrb[61].mxu0  ;;  %v1039_v12 = vpop.f32.mrb[62].mxu1 }
 0x19c   : > { %v1105_v13 = vmax.f32 %v652_v11, %v1037_v9  ;;  %v654_v15 = vpop.f32.mrb[62].mxu0  ;;  %v1041_v19 = vpop.f32.mrb[63].mxu1  ;;  %1236 = vrot.lane.b32.xlu0 %v3670_v5, %s2934_s13 }
 0x19d   : > { %v1106_v21 = vmax.f32 %v654_v15, %v1039_v12  ;;  %v656_v23 = vpop.f32.mrb[63].mxu0  ;;  %v1143_v24 = vpop.permute.xlu0 %1142 }
 0x19e   : > { %v3674_v26 = vmax.f32 %v1104_v10, %v1105_v13  ;;  %v1107_v28 = vmax.f32 %v656_v23, %v1041_v19  ;;  %v3677_v53 = vmax.f32 %v3537_v54, %v1143_v24 }
 0x1a0   : > { %v3679_v29 = vmax.f32 %v1106_v21, %v1107_v28  ;;  %1238 = vrot.lane.b32.xlu1 %v3677_v53, %s2934_s13  ;;  %1200 = vrot.lane.b32.xlu0 %v3674_v26, %s2933_s22 }
 0x1a1   : > { %v2110_v30 = vpop.f32.mrb[64].mxu1  ;;  %v1145_v31 = vpop.permute.xlu1 %1144 }
 0x1a2   : > { %v3686_v33 = vmax.f32 %v3547_v6, %v1145_v31  ;;  %v1725_v35 = vpop.f32.mrb[64].mxu0  ;;  %v2112_v37 = vpop.f32.mrb[65].mxu1 }
 0x1a3   : > { %v2269_v41 = vmax.f32 %v1725_v35, %v2110_v30  ;;  %v1727_v42 = vpop.f32.mrb[65].mxu0  ;;  %v2114_v43 = vpop.f32.mrb[66].mxu1 }
 0x1a4   : > { %v2270_v54 = vmax.f32 %v1727_v42, %v2112_v37  ;;  %v1729_v44 = vpop.f32.mrb[66].mxu0  ;;  %v2116_v48 = vpop.f32.mrb[67].mxu1  ;;  %1240 = vrot.lane.b32.xlu0 %v3686_v33, %s2934_s13  ;;  %1202 = vrot.lane.b32.xlu1 %v3679_v29, %s2933_s22 }
 0x1a5   : > { %v2271_v52 = vmax.f32 %v1729_v44, %v2114_v43  ;;  %v1731_v56 = vpop.f32.mrb[67].mxu0  ;;  %v1147_v57 = vpop.permute.xlu1 %1146 }
 0x1a6   : > { %v3692_v58 = vmax.f32 %v2269_v41, %v2270_v54  ;;  %v2272_v6 = vmax.f32 %v1731_v56, %v2116_v48  ;;  %v3695_v61 = vmax.f32 %v3549_v7, %v1147_v57 }
 0x1a8   : > { %v3697_v62 = vmax.f32 %v2271_v52, %v2272_v6  ;;  %2365 = vrot.lane.b32.xlu0 %v3692_v58, %s2933_s22  ;;  %1242 = vrot.lane.b32.xlu1 %v3695_v61, %s2934_s13 }
 0x1a9   : > { %v1149_v50 = vpop.permute.xlu0 %1148  ;;  %v1735_v60 = vpop.f32.mrb[68].mxu0 }
 0x1aa   : > { %v3704_v3 = vmax.f32 %v3559_v25, %v1149_v50  ;;  %v2120_v8 = vpop.f32.mrb[68].mxu1  ;;  %v1737_v9 = vpop.f32.mrb[69].mxu0 }
 0x1ab   : > { %v2273_v10 = vmax.f32 %v1735_v60, %v2120_v8  ;;  %v2122_v11 = vpop.f32.mrb[69].mxu1  ;;  %v1151_v12 = vpop.permute.xlu1 %1150 }
 0x1ac   : > { %v2274_v7 = vmax.f32 %v1737_v9, %v2122_v11  ;;  %v2124_v13 = vpop.f32.mrb[70].mxu1  ;;  %1244 = vrot.lane.b32.xlu0 %v3704_v3, %s2934_s13  ;;  %v1739_v15 = vpop.f32.mrb[70].mxu0  ;;  %2367 = vrot.lane.b32.xlu1 %v3697_v62, %s2933_s22  ;;  %v3711_v25 = vmax.f32 %v3561_v27, %v1151_v12 }
 0x1ad   : > { %v2275_v19 = vmax.f32 %v1739_v15, %v2124_v13  ;;  %v1741_v21 = vpop.f32.mrb[71].mxu0  ;;  %v2126_v23 = vpop.f32.mrb[71].mxu1 }
 0x1ae   : > { %v3713_v24 = vmax.f32 %v2273_v10, %v2274_v7  ;;  %v2276_v28 = vmax.f32 %v1741_v21, %v2126_v23 }
 0x1b0   : > { %v3715_v30 = vmax.f32 %v2275_v19, %v2276_v28  ;;  %2369 = vrot.lane.b32.xlu0 %v3713_v24, %s2933_s22  ;;  %1246 = vrot.lane.b32.xlu1 %v3711_v25, %s2934_s13 }
 0x1b1   : > { %v1153_v31 = vpop.permute.xlu0 %1152  ;;  %v1745_v35 = vpop.f32.mrb[72].mxu0 }
 0x1b2   : > { %v3722_v37 = vmax.f32 %v3571_v45, %v1153_v31  ;;  %v2130_v41 = vpop.f32.mrb[72].mxu1  ;;  %v1747_v42 = vpop.f32.mrb[73].mxu0 }
 0x1b3   : > { %v2277_v27 = vmax.f32 %v1745_v35, %v2130_v41  ;;  %v2132_v43 = vpop.f32.mrb[73].mxu1  ;;  %v1155_v54 = vpop.permute.xlu1 %1154 }
 0x1b4   : > { %v2278_v44 = vmax.f32 %v1747_v42, %v2132_v43  ;;  %v2134_v48 = vpop.f32.mrb[74].mxu1  ;;  %1248 = vrot.lane.b32.xlu0 %v3722_v37, %s2934_s13  ;;  %v1749_v52 = vpop.f32.mrb[74].mxu0  ;;  %2371 = vrot.lane.b32.xlu1 %v3715_v30, %s2933_s22  ;;  %v3729_v45 = vmax.f32 %v3573_v49, %v1155_v54 }
 0x1b5   : > { %v2279_v56 = vmax.f32 %v1749_v52, %v2134_v48  ;;  %v1751_v57 = vpop.f32.mrb[75].mxu0  ;;  %v2136_v6 = vpop.f32.mrb[75].mxu1 }
 0x1b6   : > { %v3731_v50 = vmax.f32 %v2277_v27, %v2278_v44  ;;  %v2280_v60 = vmax.f32 %v1751_v57, %v2136_v6 }
 0x1b8   : > { %v3733_v8 = vmax.f32 %v2279_v56, %v2280_v60  ;;  %2373 = vrot.lane.b32.xlu0 %v3731_v50, %s2933_s22  ;;  %1250 = vrot.lane.b32.xlu1 %v3729_v45, %s2934_s13 }
 0x1b9   : > { %v1157_v9 = vpop.permute.xlu0 %1156  ;;  %v1755_v10 = vpop.f32.mrb[76].mxu0 }
 0x1ba   : > { %v3740_v11 = vmax.f32 %v3581_v0, %v1157_v9  ;;  %v2140_v12 = vpop.f32.mrb[76].mxu1  ;;  %v1757_v7 = vpop.f32.mrb[77].mxu0 }
 0x1bb   : > { %v2281_v49 = vmax.f32 %v1755_v10, %v2140_v12  ;;  %v2142_v13 = vpop.f32.mrb[77].mxu1  ;;  %v1159_v15 = vpop.permute.xlu1 %1158 }
 0x1bc   : > { %v2282_v19 = vmax.f32 %v1757_v7, %v2142_v13  ;;  %v2144_v21 = vpop.f32.mrb[78].mxu1  ;;  %1252 = vrot.lane.b32.xlu0 %v3740_v11, %s2934_s13  ;;  %v1759_v23 = vpop.f32.mrb[78].mxu0  ;;  %2375 = vrot.lane.b32.xlu1 %v3733_v8, %s2933_s22  ;;  %v3747_v0 = vmax.f32 %v3583_v2, %v1159_v15 }
 0x1bd   : > { %v2283_v28 = vmax.f32 %v1759_v23, %v2144_v21  ;;  %v1761_v31 = vpop.f32.mrb[79].mxu0  ;;  %v2146_v35 = vpop.f32.mrb[79].mxu1 }
 0x1be   : > { %v3749_v41 = vmax.f32 %v2281_v49, %v2282_v19  ;;  %v2284_v42 = vmax.f32 %v1761_v31, %v2146_v35 }
 0x1c0   : > { %v3751_v27 = vmax.f32 %v2283_v28, %v2284_v42  ;;  %2377 = vrot.lane.b32.xlu0 %v3749_v41, %s2933_s22  ;;  %1254 = vrot.lane.b32.xlu1 %v3747_v0, %s2934_s13 }
 0x1c1   : > { %v1161_v43 = vpop.permute.xlu0 %1160  ;;  %v1765_v54 = vpop.f32.mrb[80].mxu0 }
 0x1c2   : > { %v3758_v44 = vmax.f32 %v3589_v16, %v1161_v43  ;;  %v2150_v48 = vpop.f32.mrb[80].mxu1  ;;  %v1767_v52 = vpop.f32.mrb[81].mxu0 }
 0x1c3   : > { %v2285_v2 = vmax.f32 %v1765_v54, %v2150_v48  ;;  %v2152_v56 = vpop.f32.mrb[81].mxu1  ;;  %v1163_v57 = vpop.permute.xlu1 %1162 }
 0x1c4   : > { %v2286_v6 = vmax.f32 %v1767_v52, %v2152_v56  ;;  %v2154_v60 = vpop.f32.mrb[82].mxu1  ;;  %1256 = vrot.lane.b32.xlu0 %v3758_v44, %s2934_s13  ;;  %v1769_v9 = vpop.f32.mrb[82].mxu0  ;;  %2379 = vrot.lane.b32.xlu1 %v3751_v27, %s2933_s22  ;;  %v3765_v16 = vmax.f32 %v3591_v18, %v1163_v57 }
 0x1c5   : > { %v2287_v10 = vmax.f32 %v1769_v9, %v2154_v60  ;;  %v1771_v12 = vpop.f32.mrb[83].mxu0  ;;  %v2156_v7 = vpop.f32.mrb[83].mxu1 }
 0x1c6   : > { %v3767_v49 = vmax.f32 %v2285_v2, %v2286_v6  ;;  %v2288_v13 = vmax.f32 %v1771_v12, %v2156_v7 }
 0x1c8   : > { %v3769_v15 = vmax.f32 %v2287_v10, %v2288_v13  ;;  %2381 = vrot.lane.b32.xlu0 %v3767_v49, %s2933_s22  ;;  %1258 = vrot.lane.b32.xlu1 %v3765_v16, %s2934_s13 }
 0x1c9   : > { %v1165_v19 = vpop.permute.xlu0 %1164  ;;  %v1775_v21 = vpop.f32.mrb[84].mxu0 }
 0x1ca   : > { %v3776_v23 = vmax.f32 %v3597_v32, %v1165_v19  ;;  %v2160_v28 = vpop.f32.mrb[84].mxu1  ;;  %v1777_v31 = vpop.f32.mrb[85].mxu0 }
 0x1cb   : > { %v2289_v18 = vmax.f32 %v1775_v21, %v2160_v28  ;;  %v2162_v35 = vpop.f32.mrb[85].mxu1  ;;  %v1167_v42 = vpop.permute.xlu1 %1166 }
 0x1cc   : > { %v2290_v43 = vmax.f32 %v1777_v31, %v2162_v35  ;;  %v2164_v54 = vpop.f32.mrb[86].mxu1  ;;  %1260 = vrot.lane.b32.xlu0 %v3776_v23, %s2934_s13  ;;  %v1779_v48 = vpop.f32.mrb[86].mxu0  ;;  %2383 = vrot.lane.b32.xlu1 %v3769_v15, %s2933_s22  ;;  %v3783_v32 = vmax.f32 %v3599_v34, %v1167_v42 }
 0x1cd   : > { %v2291_v52 = vmax.f32 %v1779_v48, %v2164_v54  ;;  %v1781_v2 = vpop.f32.mrb[87].mxu0  ;;  %v2166_v56 = vpop.f32.mrb[87].mxu1 }
 0x1ce   : > { %v3785_v57 = vmax.f32 %v2289_v18, %v2290_v43  ;;  %v2292_v6 = vmax.f32 %v1781_v2, %v2166_v56 }
 0x1d0   : > { %v3787_v60 = vmax.f32 %v2291_v52, %v2292_v6  ;;  %2385 = vrot.lane.b32.xlu0 %v3785_v57, %s2933_s22  ;;  %1262 = vrot.lane.b32.xlu1 %v3783_v32, %s2934_s13 }
 0x1d1   : > { %v1169_v9 = vpop.permute.xlu0 %1168  ;;  %v1785_v10 = vpop.f32.mrb[88].mxu0 }
 0x1d2   : > { %v3794_v12 = vmax.f32 %v3605_v51, %v1169_v9  ;;  %v2170_v7 = vpop.f32.mrb[88].mxu1  ;;  %v1787_v13 = vpop.f32.mrb[89].mxu0 }
 0x1d3   : > { %v2293_v34 = vmax.f32 %v1785_v10, %v2170_v7  ;;  %v2172_v19 = vpop.f32.mrb[89].mxu1  ;;  %v1171_v21 = vpop.permute.xlu1 %1170 }
 0x1d4   : > { %v2294_v28 = vmax.f32 %v1787_v13, %v2172_v19  ;;  %v2174_v31 = vpop.f32.mrb[90].mxu1  ;;  %1264 = vrot.lane.b32.xlu0 %v3794_v12, %s2934_s13  ;;  %v1789_v18 = vpop.f32.mrb[90].mxu0  ;;  %2387 = vrot.lane.b32.xlu1 %v3787_v60, %s2933_s22  ;;  %v3801_v51 = vmax.f32 %v3607_v55, %v1171_v21 }
 0x1d5   : > { %v2295_v35 = vmax.f32 %v1789_v18, %v2174_v31  ;;  %v1791_v42 = vpop.f32.mrb[91].mxu0  ;;  %v2176_v43 = vpop.f32.mrb[91].mxu1 }
 0x1d6   : > { %v3803_v54 = vmax.f32 %v2293_v34, %v2294_v28  ;;  %v2296_v48 = vmax.f32 %v1791_v42, %v2176_v43 }
 0x1d8   : > { %v3805_v52 = vmax.f32 %v2295_v35, %v2296_v48  ;;  %2389 = vrot.lane.b32.xlu0 %v3803_v54, %s2933_s22  ;;  %1266 = vrot.lane.b32.xlu1 %v3801_v51, %s2934_s13 }
 0x1d9   : > { %v1173_v2 = vpop.permute.xlu0 %1172  ;;  %v1795_v56 = vpop.f32.mrb[92].mxu0 }
 0x1da   : > { %v3812_v6 = vmax.f32 %v3613_v1, %v1173_v2  ;;  %v2180_v9 = vpop.f32.mrb[92].mxu1  ;;  %v1797_v10 = vpop.f32.mrb[93].mxu0 }
 0x1db   : > { %v2297_v55 = vmax.f32 %v1795_v56, %v2180_v9  ;;  %v2182_v7 = vpop.f32.mrb[93].mxu1  ;;  %v1175_v13 = vpop.permute.xlu1 %1174 }
 0x1dc   : > { %v2298_v34 = vmax.f32 %v1797_v10, %v2182_v7  ;;  %v2184_v19 = vpop.f32.mrb[94].mxu1  ;;  %1268 = vrot.lane.b32.xlu0 %v3812_v6, %s2934_s13  ;;  %v1799_v21 = vpop.f32.mrb[94].mxu0  ;;  %2391 = vrot.lane.b32.xlu1 %v3805_v52, %s2933_s22  ;;  %v3819_v1 = vmax.f32 %v3615_v4, %v1175_v13 }
 0x1dd   : > { %v2299_v28 = vmax.f32 %v1799_v21, %v2184_v19  ;;  %v1801_v31 = vpop.f32.mrb[95].mxu0  ;;  %v2186_v18 = vpop.f32.mrb[95].mxu1 }
 0x1de   : > { %v3821_v35 = vmax.f32 %v2297_v55, %v2298_v34  ;;  %v2300_v42 = vmax.f32 %v1801_v31, %v2186_v18 }
 0x1e0   : > { %v3823_v43 = vmax.f32 %v2299_v28, %v2300_v42  ;;  %2393 = vrot.lane.b32.xlu0 %v3821_v35, %s2933_s22  ;;  %1270 = vrot.lane.b32.xlu1 %v3819_v1, %s2934_s13 }
 0x1e1   : > { %v1177_v48 = vpop.permute.xlu0 %1176  ;;  %v1805_v2 = vpop.f32.mrb[96].mxu0 }
 0x1e2   : > { %v3830_v56 = vmax.f32 %v3621_v20, %v1177_v48  ;;  %v2190_v9 = vpop.f32.mrb[96].mxu1  ;;  %v1807_v10 = vpop.f32.mrb[97].mxu0 }
 0x1e3   : > { %v2301_v4 = vmax.f32 %v1805_v2, %v2190_v9  ;;  %v2192_v7 = vpop.f32.mrb[97].mxu1  ;;  %v1179_v55 = vpop.permute.xlu1 %1178 }
 0x1e4   : > { %v2302_v13 = vmax.f32 %v1807_v10, %v2192_v7  ;;  %v2194_v34 = vpop.f32.mrb[98].mxu1  ;;  %1272 = vrot.lane.b32.xlu0 %v3830_v56, %s2934_s13  ;;  %v1809_v19 = vpop.f32.mrb[98].mxu0  ;;  %2395 = vrot.lane.b32.xlu1 %v3823_v43, %s2933_s22  ;;  %v3837_v20 = vmax.f32 %v3623_v22, %v1179_v55 }
 0x1e5   : > { %v2303_v21 = vmax.f32 %v1809_v19, %v2194_v34  ;;  %v1811_v28 = vpop.f32.mrb[99].mxu0  ;;  %v2196_v31 = vpop.f32.mrb[99].mxu1 }
 0x1e6   : > { %v3839_v18 = vmax.f32 %v2301_v4, %v2302_v13  ;;  %v2304_v42 = vmax.f32 %v1811_v28, %v2196_v31 }
 0x1e8   : > { %v3841_v48 = vmax.f32 %v2303_v21, %v2304_v42  ;;  %2397 = vrot.lane.b32.xlu0 %v3839_v18, %s2933_s22  ;;  %1274 = vrot.lane.b32.xlu1 %v3837_v20, %s2934_s13 }
 0x1e9   : > { %v1181_v2 = vpop.permute.xlu0 %1180  ;;  %v1815_v9 = vpop.f32.mrb[100].mxu0 }
 0x1ea   : > { %4435 = vst [vmem:[#allocation2_spill] sm:$0xff] %v3841_v48  ;;  %v3848_v10 = vmax.f32 %v3629_v38, %v1181_v2  ;;  %v2200_v7 = vpop.f32.mrb[100].mxu1  ;;  %v1817_v34 = vpop.f32.mrb[101].mxu0 }
 0x1eb   : > { %v2305_v22 = vmax.f32 %v1815_v9, %v2200_v7  ;;  %v2202_v55 = vpop.f32.mrb[101].mxu1  ;;  %v1183_v4 = vpop.permute.xlu1 %1182 }
 0x1ec   : > { %v2306_v13 = vmax.f32 %v1817_v34, %v2202_v55  ;;  %v2204_v19 = vpop.f32.mrb[102].mxu1  ;;  %1276 = vrot.lane.b32.xlu0 %v3848_v10, %s2934_s13  ;;  %v1819_v21 = vpop.f32.mrb[102].mxu0  ;;  %2399 = vrot.lane.b32.xlu1 %v3841_v48, %s2933_s22  ;;  %v3855_v38 = vmax.f32 %v3631_v40, %v1183_v4 }
 0x1ed   : > { %v2307_v28 = vmax.f32 %v1819_v21, %v2204_v19  ;;  %v1821_v31 = vpop.f32.mrb[103].mxu0  ;;  %v2206_v42 = vpop.f32.mrb[103].mxu1 }
 0x1ee   : > { %4436 = vst [vmem:[#allocation3_spill] sm:$0xff] %v3855_v38  ;;  %v3857_v2 = vmax.f32 %v2305_v22, %v2306_v13  ;;  %v2308_v9 = vmax.f32 %v1821_v31, %v2206_v42 }
 0x1f0   : > { %v3859_v7 = vmax.f32 %v2307_v28, %v2308_v9  ;;  %2401 = vrot.lane.b32.xlu0 %v3857_v2, %s2933_s22  ;;  %1278 = vrot.lane.b32.xlu1 %v3855_v38, %s2934_s13 }
 0x1f1   : > { %v1185_v34 = vpop.permute.xlu0 %1184  ;;  %v1825_v55 = vpop.f32.mrb[104].mxu0 }
 0x1f2   : > { %4437 = vst [vmem:[#allocation4_spill] sm:$0xff] %v3859_v7  ;;  %v3866_v19 = vmax.f32 %v3637_v63, %v1185_v34  ;;  %v2210_v21 = vpop.f32.mrb[104].mxu1  ;;  %v1827_v48 = vpop.f32.mrb[105].mxu0 }
 0x1f3   : > { %v2309_v40 = vmax.f32 %v1825_v55, %v2210_v21  ;;  %v2212_v4 = vpop.f32.mrb[105].mxu1  ;;  %v1187_v22 = vpop.permute.xlu1 %1186 }
 0x1f4   : > { %v2310_v13 = vmax.f32 %v1827_v48, %v2212_v4  ;;  %v2214_v31 = vpop.f32.mrb[106].mxu1  ;;  %1280 = vrot.lane.b32.xlu0 %v3866_v19, %s2934_s13  ;;  %v1829_v28 = vpop.f32.mrb[106].mxu0  ;;  %2403 = vrot.lane.b32.xlu1 %v3859_v7, %s2933_s22  ;;  %v3873_v63 = vmax.f32 %v3639_v47, %v1187_v22 }
 0x1f5   : > { %v2311_v42 = vmax.f32 %v1829_v28, %v2214_v31  ;;  %v1831_v9 = vpop.f32.mrb[107].mxu0  ;;  %v2216_v38 = vpop.f32.mrb[107].mxu1 }
 0x1f6   : > { %4438 = vst [vmem:[#allocation5_spill] sm:$0xff] %v3873_v63  ;;  %v3875_v34 = vmax.f32 %v2309_v40, %v2310_v13  ;;  %v2312_v55 = vmax.f32 %v1831_v9, %v2216_v38 }
 0x1f8   : > { %v3877_v21 = vmax.f32 %v2311_v42, %v2312_v55  ;;  %2405 = vrot.lane.b32.xlu0 %v3875_v34, %s2933_s22  ;;  %1282 = vrot.lane.b32.xlu1 %v3873_v63, %s2934_s13 }
 0x1f9   : > { %v1189_v48 = vpop.permute.xlu0 %1188  ;;  %v1835_v4 = vpop.f32.mrb[108].mxu0 }
 0x1fa   : > { %4439 = vst [vmem:[#allocation6_spill] sm:$0xff] %v3877_v21  ;;  %v3884_v31 = vmax.f32 %v3645_v14, %v1189_v48  ;;  %v2220_v28 = vpop.f32.mrb[108].mxu1  ;;  %v1837_v7 = vpop.f32.mrb[109].mxu0 }
 0x1fb   : > { %v2313_v47 = vmax.f32 %v1835_v4, %v2220_v28  ;;  %v2222_v22 = vpop.f32.mrb[109].mxu1  ;;  %v1191_v40 = vpop.permute.xlu1 %1190 }
 0x1fc   : > { %v2314_v13 = vmax.f32 %v1837_v7, %v2222_v22  ;;  %v2224_v38 = vpop.f32.mrb[110].mxu1  ;;  %1284 = vrot.lane.b32.xlu0 %v3884_v31, %s2934_s13  ;;  %v1839_v42 = vpop.f32.mrb[110].mxu0  ;;  %2407 = vrot.lane.b32.xlu1 %v3877_v21, %s2933_s22  ;;  %v3891_v14 = vmax.f32 %v3647_v17, %v1191_v40 }
 0x1fd   : > { %v2315_v9 = vmax.f32 %v1839_v42, %v2224_v38  ;;  %v1841_v55 = vpop.f32.mrb[111].mxu0  ;;  %v2226_v63 = vpop.f32.mrb[111].mxu1 }
 0x1fe   : > { %4440 = vst [vmem:[#allocation7_spill] sm:$0xff] %v3891_v14  ;;  %v3893_v48 = vmax.f32 %v2313_v47, %v2314_v13  ;;  %v2316_v4 = vmax.f32 %v1841_v55, %v2226_v63 }
 0x200   : > { %v3895_v28 = vmax.f32 %v2315_v9, %v2316_v4  ;;  %2409 = vrot.lane.b32.xlu0 %v3893_v48, %s2933_s22  ;;  %1286 = vrot.lane.b32.xlu1 %v3891_v14, %s2934_s13 }
 0x201   : > { %v1193_v7 = vpop.permute.xlu0 %1192  ;;  %v1845_v22 = vpop.f32.mrb[112].mxu0 }
 0x202   : > { %v3902_v38 = vmax.f32 %v3653_v36, %v1193_v7  ;;  %v2230_v42 = vpop.f32.mrb[112].mxu1  ;;  %v1847_v21 = vpop.f32.mrb[113].mxu0 }
 0x203   : > { %v2317_v17 = vmax.f32 %v1845_v22, %v2230_v42  ;;  %v2232_v40 = vpop.f32.mrb[113].mxu1  ;;  %v1195_v47 = vpop.permute.xlu1 %1194 }
 0x204   : > { %v2318_v13 = vmax.f32 %v1847_v21, %v2232_v40  ;;  %v2234_v63 = vpop.f32.mrb[114].mxu1  ;;  %1288 = vrot.lane.b32.xlu0 %v3902_v38, %s2934_s13  ;;  %v1849_v9 = vpop.f32.mrb[114].mxu0  ;;  %2411 = vrot.lane.b32.xlu1 %v3895_v28, %s2933_s22  ;;  %v3909_v36 = vmax.f32 %v3655_v39, %v1195_v47 }
 0x205   : > { %v2319_v55 = vmax.f32 %v1849_v9, %v2234_v63  ;;  %v1851_v4 = vpop.f32.mrb[115].mxu0  ;;  %v2236_v14 = vpop.f32.mrb[115].mxu1 }
 0x206   : > { %4441 = vst [vmem:[#allocation8_spill] sm:$0xff] %v3909_v36  ;;  %v3911_v7 = vmax.f32 %v2317_v17, %v2318_v13  ;;  %v2320_v22 = vmax.f32 %v1851_v4, %v2236_v14 }
 0x208   : > { %4442 = vst [vmem:[#allocation9_spill] sm:$0xff] %v3911_v7  ;;  %v3913_v42 = vmax.f32 %v2319_v55, %v2320_v22  ;;  %2413 = vrot.lane.b32.xlu0 %v3911_v7, %s2933_s22  ;;  %1290 = vrot.lane.b32.xlu1 %v3909_v36, %s2934_s13 }
 0x209   : > { %v1197_v21 = vpop.permute.xlu0 %1196  ;;  %v1855_v40 = vpop.f32.mrb[116].mxu0 }
 0x20a   : > { %v3920_v63 = vmax.f32 %v3661_v46, %v1197_v21  ;;  %v2240_v9 = vpop.f32.mrb[116].mxu1  ;;  %v1857_v39 = vpop.f32.mrb[117].mxu0 }
 0x20b   : > { %v2321_v47 = vmax.f32 %v1855_v40, %v2240_v9  ;;  %v2242_v17 = vpop.f32.mrb[117].mxu1  ;;  %v1199_v13 = vpop.permute.xlu1 %1198  ;;  %v3935_v9 = vld [vmem:[%s4397_s2] ss:$0 sm:$0xff] }
 0x20c   : > { %4443 = vst [vmem:[#allocation10_spill] sm:$0xff] %v3920_v63  ;;  %v2322_v14 = vmax.f32 %v1857_v39, %v2242_v17  ;;  %v2244_v55 = vpop.f32.mrb[118].mxu1  ;;  %1292 = vrot.lane.b32.xlu0 %v3920_v63, %s2934_s13  ;;  %v1859_v4 = vpop.f32.mrb[118].mxu0  ;;  %2415 = vrot.lane.b32.xlu1 %v3913_v42, %s2933_s22  ;;  %v3928_v46 = vmax.f32 %v3663_v59, %v1199_v13 }
 0x20d   : > { %v2323_v22 = vmax.f32 %v1859_v4, %v2244_v55  ;;  %v1861_v36 = vpop.f32.mrb[119].mxu0  ;;  %v2246_v7 = vpop.f32.mrb[119].mxu1 }
 0x20e   : > { %4444 = vst [vmem:[#allocation11_spill] sm:$0xff] %v3928_v46  ;;  %v3930_v21 = vmax.f32 %v2321_v47, %v2322_v14  ;;  %v2324_v40 = vmax.f32 %v1861_v36, %v2246_v7  ;;  %v1237_v39 = vpop.permute.xlu0 %1236 }
 0x20f   : > { %v1300_v17 = vmax.f32 %v3670_v5, %v1237_v39 }
 0x210   : > { %4445 = vst [vmem:[#allocation12_spill] sm:$0xff] %v3930_v21  ;;  %v3938_v63 = vmax.f32 %v2323_v22, %v2324_v40  ;;  %2417 = vrot.lane.b32.xlu0 %v3930_v21, %s2933_s22  ;;  %1294 = vrot.lane.b32.xlu1 %v3928_v46, %s2934_s13 }
 0x211   : > { %v1338_v59 = vadd.f32 %v3935_v9, %v1300_v17  ;;  %v2250_v36 = vpop.f32.mrb[120].mxu1  ;;  %v1865_v7 = vpop.f32.mrb[120].mxu0 }
 0x212   : > { %v1239_v5 = vpop.permute.xlu1 %1238  ;;  %v1201_v47 = vpop.permute.xlu0 %1200  ;;  %v2325_v13 = vmax.f32 %v1865_v7, %v2250_v36 }
 0x213   : > { %1371 = vst.msk [vmem:[%s3943_s24] sm:$0xff] %vm1370_vm0, %v1338_v59  ;;  %v1301_v14 = vmax.f32 %v3677_v53, %v1239_v5  ;;  %v3954_v55 = vmax.f32 %v3674_v26, %v1201_v47  ;;  %v1867_v4 = vpop.f32.mrb[121].mxu0  ;;  %v2252_v22 = vpop.f32.mrb[121].mxu1 }
 0x214   : > { %v2326_v40 = vmax.f32 %v1867_v4, %v2252_v22  ;;  %v1869_v39 = vpop.f32.mrb[122].mxu0  ;;  %v2254_v46 = vpop.f32.mrb[122].mxu1  ;;  %2419 = vrot.lane.b32.xlu1 %v3938_v63, %s2933_s22 }
 0x215   : > { %v1339_v17 = vadd.f32 %v3935_v9, %v1301_v14  ;;  %v2327_v21 = vmax.f32 %v1869_v39, %v2254_v46  ;;  %v2256_v36 = vpop.f32.mrb[123].mxu1  ;;  %1296 = vrot.lane.b32.xlu0 %v3954_v55, %s2934_s13  ;;  %v1871_v53 = vpop.f32.mrb[123].mxu0 }
 0x216   : > { %v3961_v59 = vmax.f32 %v2325_v13, %v2326_v40  ;;  %v2328_v26 = vmax.f32 %v1871_v53, %v2256_v36  ;;  %v1241_v7 = vpop.permute.xlu0 %1240  ;;  %v1203_v5 = vpop.permute.xlu1 %1202 }
 0x217   : > { %1372 = vst.msk [vmem:[%s3943_s24 + $0x8] sm:$0xff] %vm1370_vm0, %v1339_v17  ;;  %v1302_v47 = vmax.f32 %v3686_v33, %v1241_v7  ;;  %v3967_v4 = vmax.f32 %v3679_v29, %v1203_v5 }
 0x218   : > { %v3969_v14 = vmax.f32 %v2327_v21, %v2328_v26 }
 0x219   : > { %4446 = vst [vmem:[#allocation13_spill] sm:$0xff] %v3967_v4  ;;  %v1340_v46 = vadd.f32 %v3935_v9, %v1302_v47  ;;  %2421 = vrot.lane.b32.xlu0 %v3961_v59, %s2933_s22  ;;  %1298 = vrot.lane.b32.xlu1 %v3967_v4, %s2934_s13  ;;  %v2260_v13 = vpop.f32.mrb[124].mxu1  ;;  %v1875_v22 = vpop.f32.mrb[124].mxu0 }
 0x21a   : > { %v2366_v40 = vpop.permute.xlu0 %2365  ;;  %v2329_v39 = vmax.f32 %v1875_v22, %v2260_v13  ;;  %v1243_v17 = vpop.permute.xlu1 %1242 }
 0x21b   : > { %1373 = vst.msk [vmem:[%s3943_s24 + $0x10] sm:$0xff] %vm1370_vm0, %v1340_v46  ;;  %v3979_v29 = vmax.f32 %v3692_v58, %v2366_v40  ;;  %v1303_v33 = vmax.f32 %v3695_v61, %v1243_v17  ;;  %v1877_v21 = vpop.f32.mrb[125].mxu0  ;;  %v2262_v36 = vpop.f32.mrb[125].mxu1 }
 0x21c   : > { %v2330_v53 = vmax.f32 %v1877_v21, %v2262_v36  ;;  %v1879_v26 = vpop.f32.mrb[126].mxu0  ;;  %v2264_v7 = vpop.f32.mrb[126].mxu1 }
 0x21d   : > { %v1341_v5 = vadd.f32 %v3935_v9, %v1303_v33  ;;  %v2331_v47 = vmax.f32 %v1879_v26, %v2264_v7  ;;  %v2266_v4 = vpop.f32.mrb[127].mxu1  ;;  %2461 = vrot.lane.b32.xlu0 %v3979_v29, %s2934_s13  ;;  %v1881_v46 = vpop.f32.mrb[127].mxu0  ;;  %2423 = vrot.lane.b32.xlu1 %v3969_v14, %s2933_s22 }
 0x21e   : > { %v3987_v58 = vmax.f32 %v2329_v39, %v2330_v53  ;;  %v2332_v61 = vmax.f32 %v1881_v46, %v2266_v4  ;;  %v1245_v13 = vpop.permute.xlu0 %1244  ;;  %v2368_v22 = vpop.permute.xlu1 %2367 }
 0x21f   : > { %1374 = vst.msk [vmem:[%s3943_s24 + $0x18] sm:$0xff] %vm1370_vm0, %v1341_v5  ;;  %v1304_v40 = vmax.f32 %v3704_v3, %v1245_v13  ;;  %v3993_v17 = vmax.f32 %v3697_v62, %v2368_v22 }
 0x220   : > { %v3995_v33 = vmax.f32 %v2331_v47, %v2332_v61 }
 0x221   : > { %v1342_v21 = vadd.f32 %v3935_v9, %v1304_v40  ;;  %2425 = vrot.lane.b32.xlu0 %v3987_v58, %s2933_s22  ;;  %2463 = vrot.lane.b32.xlu1 %v3993_v17, %s2934_s13 }
 0x222   : > { %v2370_v4 = vpop.permute.xlu0 %2369  ;;  %v1247_v39 = vpop.permute.xlu1 %1246 }
 0x223   : > { %1375 = vst.msk [vmem:[%s3943_s24 + $0x20] sm:$0xff] %vm1370_vm0, %v1342_v21  ;;  %v4005_v3 = vmax.f32 %v3713_v24, %v2370_v4  ;;  %v1305_v62 = vmax.f32 %v3711_v25, %v1247_v39 }
 0x225   : > { %v1343_v36 = vadd.f32 %v3935_v9, %v1305_v62  ;;  %2465 = vrot.lane.b32.xlu0 %v4005_v3, %s2934_s13  ;;  %2427 = vrot.lane.b32.xlu1 %v3995_v33, %s2933_s22 }
 0x226   : > { %v1249_v53 = vpop.permute.xlu0 %1248  ;;  %v2372_v26 = vpop.permute.xlu1 %2371 }
 0x227   : > { %1376 = vst.msk [vmem:[%s3943_s24 + $0x28] sm:$0xff] %vm1370_vm0, %v1343_v36  ;;  %v1306_v7 = vmax.f32 %v3722_v37, %v1249_v53  ;;  %v4017_v24 = vmax.f32 %v3715_v30, %v2372_v26 }
 0x229   : > { %v1344_v25 = vadd.f32 %v3935_v9, %v1306_v7  ;;  %2467 = vrot.lane.b32.xlu1 %v4017_v24, %s2934_s13 }
 0x22a   : > { %v2374_v5 = vpop.permute.xlu0 %2373  ;;  %v1251_v47 = vpop.permute.xlu1 %1250 }
 0x22b   : > { %1377 = vst.msk [vmem:[%s3943_s24 + $0x30] sm:$0xff] %vm1370_vm0, %v1344_v25  ;;  %v4025_v46 = vmax.f32 %v3731_v50, %v2374_v5  ;;  %v1307_v61 = vmax.f32 %v3729_v45, %v1251_v47 }
 0x22d   : > { %v1345_v37 = vadd.f32 %v3935_v9, %v1307_v61  ;;  %2469 = vrot.lane.b32.xlu0 %v4025_v46, %s2934_s13 }
 0x22e   : > { %v1253_v30 = vpop.permute.xlu0 %1252  ;;  %v2376_v13 = vpop.permute.xlu1 %2375 }
 0x22f   : > { %1378 = vst.msk [vmem:[%s3943_s24 + $0x38] sm:$0xff] %vm1370_vm0, %v1345_v37  ;;  %v1308_v22 = vmax.f32 %v3740_v11, %v1253_v30  ;;  %v4035_v40 = vmax.f32 %v3733_v8, %v2376_v13 }
 0x231   : > { %v1346_v50 = vadd.f32 %v3935_v9, %v1308_v22  ;;  %2471 = vrot.lane.b32.xlu1 %v4035_v40, %s2934_s13 }
 0x232   : > { %v2378_v45 = vpop.permute.xlu0 %2377  ;;  %v1255_v21 = vpop.permute.xlu1 %1254 }
 0x233   : > { %1379 = vst.msk [vmem:[%s3943_s24 + $0x40] sm:$0xff] %vm1370_vm0, %v1346_v50  ;;  %v4043_v4 = vmax.f32 %v3749_v41, %v2378_v45  ;;  %v1309_v39 = vmax.f32 %v3747_v0, %v1255_v21 }
 0x235   : > { %v1347_v11 = vadd.f32 %v3935_v9, %v1309_v39  ;;  %2473 = vrot.lane.b32.xlu0 %v4043_v4, %s2934_s13 }
 0x236   : > { %v1257_v8 = vpop.permute.xlu0 %1256  ;;  %v2380_v62 = vpop.permute.xlu1 %2379 }
 0x237   : > { %1380 = vst.msk [vmem:[%s3943_s24 + $0x48] sm:$0xff] %vm1370_vm0, %v1347_v11  ;;  %v1310_v36 = vmax.f32 %v3758_v44, %v1257_v8  ;;  %v4053_v53 = vmax.f32 %v3751_v27, %v2380_v62 }
 0x239   : > { %v1348_v41 = vadd.f32 %v3935_v9, %v1310_v36  ;;  %2475 = vrot.lane.b32.xlu1 %v4053_v53, %s2934_s13 }
 0x23a   : > { %v2382_v0 = vpop.permute.xlu0 %2381  ;;  %v1259_v26 = vpop.permute.xlu1 %1258 }
 0x23b   : > { %1381 = vst.msk [vmem:[%s3943_s24 + $0x50] sm:$0xff] %vm1370_vm0, %v1348_v41  ;;  %v4061_v7 = vmax.f32 %v3767_v49, %v2382_v0  ;;  %v1311_v25 = vmax.f32 %v3765_v16, %v1259_v26 }
 0x23d   : > { %v1349_v44 = vadd.f32 %v3935_v9, %v1311_v25  ;;  %2477 = vrot.lane.b32.xlu0 %v4061_v7, %s2934_s13 }
 0x23e   : > { %v1261_v27 = vpop.permute.xlu0 %1260  ;;  %v2384_v5 = vpop.permute.xlu1 %2383 }
 0x23f   : > { %1382 = vst.msk [vmem:[%s3943_s24 + $0x58] sm:$0xff] %vm1370_vm0, %v1349_v44  ;;  %v1312_v47 = vmax.f32 %v3776_v23, %v1261_v27  ;;  %v4071_v61 = vmax.f32 %v3769_v15, %v2384_v5 }
 0x241   : > { %v1350_v49 = vadd.f32 %v3935_v9, %v1312_v47  ;;  %2479 = vrot.lane.b32.xlu1 %v4071_v61, %s2934_s13 }
 0x242   : > { %v2386_v16 = vpop.permute.xlu0 %2385  ;;  %v1263_v37 = vpop.permute.xlu1 %1262 }
 0x243   : > { %1383 = vst.msk [vmem:[%s3943_s24 + $0x60] sm:$0xff] %vm1370_vm0, %v1350_v49  ;;  %v4079_v30 = vmax.f32 %v3785_v57, %v2386_v16  ;;  %v1313_v13 = vmax.f32 %v3783_v32, %v1263_v37 }
 0x245   : > { %v1351_v23 = vadd.f32 %v3935_v9, %v1313_v13  ;;  %2481 = vrot.lane.b32.xlu0 %v4079_v30, %s2934_s13  ;;  %v4447_v13 = vld [vmem:[#allocation2_spill] sm:$0xff] }
 0x246   : > { %v1265_v15 = vpop.permute.xlu0 %1264  ;;  %v2388_v22 = vpop.permute.xlu1 %2387 }
 0x247   : > { %1384 = vst.msk [vmem:[%s3943_s24 + $0x68] sm:$0xff] %vm1370_vm0, %v1351_v23  ;;  %v1314_v50 = vmax.f32 %v3794_v12, %v1265_v15  ;;  %v4089_v45 = vmax.f32 %v3787_v60, %v2388_v22 }
 0x249   : > { %v1352_v57 = vadd.f32 %v3935_v9, %v1314_v50  ;;  %2483 = vrot.lane.b32.xlu1 %v4089_v45, %s2934_s13  ;;  %v4448_v50 = vld [vmem:[#allocation3_spill] sm:$0xff] }
 0x24a   : > { %v2390_v32 = vpop.permute.xlu0 %2389  ;;  %v1267_v21 = vpop.permute.xlu1 %1266 }
 0x24b   : > { %1385 = vst.msk [vmem:[%s3943_s24 + $0x70] sm:$0xff] %vm1370_vm0, %v1352_v57  ;;  %v4097_v39 = vmax.f32 %v3803_v54, %v2390_v32  ;;  %v1315_v11 = vmax.f32 %v3801_v51, %v1267_v21 }
 0x24d   : > { %v1353_v12 = vadd.f32 %v3935_v9, %v1315_v11  ;;  %2485 = vrot.lane.b32.xlu0 %v4097_v39, %s2934_s13 }
 0x24e   : > { %v1269_v60 = vpop.permute.xlu0 %1268  ;;  %v2392_v8 = vpop.permute.xlu1 %2391 }
 0x24f   : > { %1386 = vst.msk [vmem:[%s3943_s24 + $0x78] sm:$0xff] %vm1370_vm0, %v1353_v12  ;;  %v1316_v62 = vmax.f32 %v3812_v6, %v1269_v60  ;;  %v4107_v36 = vmax.f32 %v3805_v52, %v2392_v8  ;;  %v4449_v12 = vld [vmem:[#allocation4_spill] sm:$0xff] }
 0x251   : > { %v1354_v54 = vadd.f32 %v3935_v9, %v1316_v62  ;;  %2487 = vrot.lane.b32.xlu1 %v4107_v36, %s2934_s13 }
 0x252   : > { %v2394_v51 = vpop.permute.xlu0 %2393  ;;  %v1271_v41 = vpop.permute.xlu1 %1270 }
 0x253   : > { %1387 = vst.msk [vmem:[%s3943_s24 + $0x80] sm:$0xff] %vm1370_vm0, %v1354_v54  ;;  %v4115_v0 = vmax.f32 %v3821_v35, %v2394_v51  ;;  %v1317_v26 = vmax.f32 %v3819_v1, %v1271_v41  ;;  %v4450_v51 = vld [vmem:[#allocation5_spill] sm:$0xff] }
 0x255   : > { %v1355_v6 = vadd.f32 %v3935_v9, %v1317_v26  ;;  %2489 = vrot.lane.b32.xlu0 %v4115_v0, %s2934_s13 }
 0x256   : > { %v1273_v52 = vpop.permute.xlu0 %1272  ;;  %v2396_v25 = vpop.permute.xlu1 %2395 }
 0x257   : > { %1388 = vst.msk [vmem:[%s3943_s24 + $0x88] sm:$0xff] %vm1370_vm0, %v1355_v6  ;;  %v1318_v44 = vmax.f32 %v3830_v56, %v1273_v52  ;;  %v4125_v27 = vmax.f32 %v3823_v43, %v2396_v25  ;;  %v4451_v25 = vld [vmem:[#allocation6_spill] sm:$0xff] }
 0x259   : > { %v1356_v35 = vadd.f32 %v3935_v9, %v1318_v44  ;;  %2491 = vrot.lane.b32.xlu1 %v4125_v27, %s2934_s13 }
 0x25a   : > { %v2398_v1 = vpop.permute.xlu0 %2397  ;;  %v1275_v5 = vpop.permute.xlu1 %1274 }
 0x25b   : > { %1389 = vst.msk [vmem:[%s3943_s24 + $0x90] sm:$0xff] %vm1370_vm0, %v1356_v35  ;;  %v4133_v47 = vmax.f32 %v3839_v18, %v2398_v1  ;;  %v1319_v49 = vmax.f32 %v3837_v20, %v1275_v5 }
 0x25d   : > { %v1357_v56 = vadd.f32 %v3935_v9, %v1319_v49  ;;  %2493 = vrot.lane.b32.xlu0 %v4133_v47, %s2934_s13  ;;  %v4452_v49 = vld [vmem:[#allocation7_spill] sm:$0xff] }
 0x25e   : > { %v1277_v43 = vpop.permute.xlu0 %1276  ;;  %v2400_v16 = vpop.permute.xlu1 %2399 }
 0x25f   : > { %1390 = vst.msk [vmem:[%s3943_s24 + $0x98] sm:$0xff] %vm1370_vm0, %v1357_v56  ;;  %v1320_v37 = vmax.f32 %v3848_v10, %v1277_v43  ;;  %v4143_v23 = vmax.f32 %v4447_v13, %v2400_v16 }
 0x261   : > { %v1358_v18 = vadd.f32 %v3935_v9, %v1320_v37  ;;  %2495 = vrot.lane.b32.xlu1 %v4143_v23, %s2934_s13 }
 0x262   : > { %v2402_v20 = vpop.permute.xlu0 %2401  ;;  %v1279_v15 = vpop.permute.xlu1 %1278 }
 0x263   : > { %1391 = vst.msk [vmem:[%s3943_s24 + $0xa0] sm:$0xff] %vm1370_vm0, %v1358_v18  ;;  %v4151_v22 = vmax.f32 %v3857_v2, %v2402_v20  ;;  %v1321_v57 = vmax.f32 %v4448_v50, %v1279_v15  ;;  %v4453_v15 = vld [vmem:[#allocation9_spill] sm:$0xff] }
 0x265   : > { %v1359_v10 = vadd.f32 %v3935_v9, %v1321_v57  ;;  %2497 = vrot.lane.b32.xlu0 %v4151_v22, %s2934_s13  ;;  %v4454_v57 = vld [vmem:[#allocation8_spill] sm:$0xff] }
 0x266   : > { %v1281_v32 = vpop.permute.xlu0 %1280  ;;  %v2404_v21 = vpop.permute.xlu1 %2403 }
 0x267   : > { %1392 = vst.msk [vmem:[%s3943_s24 + $0xa8] sm:$0xff] %vm1370_vm0, %v1359_v10  ;;  %v1322_v11 = vmax.f32 %v3866_v19, %v1281_v32  ;;  %v4161_v60 = vmax.f32 %v4449_v12, %v2404_v21  ;;  %v4455_v21 = vld [vmem:[#allocation10_spill] sm:$0xff] }
 0x269   : > { %v1360_v2 = vadd.f32 %v3935_v9, %v1322_v11  ;;  %2499 = vrot.lane.b32.xlu1 %v4161_v60, %s2934_s13 }
 0x26a   : > { %v2406_v8 = vpop.permute.xlu0 %2405  ;;  %v1283_v62 = vpop.permute.xlu1 %1282 }
 0x26b   : > { %1393 = vst.msk [vmem:[%s3943_s24 + $0xb0] sm:$0xff] %vm1370_vm0, %v1360_v2  ;;  %v4169_v54 = vmax.f32 %v3875_v34, %v2406_v8  ;;  %v1323_v41 = vmax.f32 %v4450_v51, %v1283_v62  ;;  %v4456_v51 = vld [vmem:[#allocation12_spill] sm:$0xff] }
 0x26d   : > { %v1361_v19 = vadd.f32 %v3935_v9, %v1323_v41  ;;  %2501 = vrot.lane.b32.xlu0 %v4169_v54, %s2934_s13 }
 0x26e   : > { %v1285_v26 = vpop.permute.xlu0 %1284  ;;  %v2408_v6 = vpop.permute.xlu1 %2407 }
 0x26f   : > { %1394 = vst.msk [vmem:[%s3943_s24 + $0xb8] sm:$0xff] %vm1370_vm0, %v1361_v19  ;;  %v1324_v52 = vmax.f32 %v3884_v31, %v1285_v26  ;;  %v4179_v44 = vmax.f32 %v4451_v25, %v2408_v6  ;;  %v4457_v19 = vld [vmem:[#allocation11_spill] sm:$0xff] }
 0x271   : > { %v1362_v34 = vadd.f32 %v3935_v9, %v1324_v52  ;;  %2503 = vrot.lane.b32.xlu1 %v4179_v44, %s2934_s13 }
 0x272   : > { %v2410_v35 = vpop.permute.xlu0 %2409  ;;  %v1287_v1 = vpop.permute.xlu1 %1286 }
 0x273   : > { %1395 = vst.msk [vmem:[%s3943_s24 + $0xc0] sm:$0xff] %vm1370_vm0, %v1362_v34  ;;  %v4187_v5 = vmax.f32 %v3893_v48, %v2410_v35  ;;  %v1325_v56 = vmax.f32 %v4452_v49, %v1287_v1 }
 0x275   : > { %v1363_v31 = vadd.f32 %v3935_v9, %v1325_v56  ;;  %2505 = vrot.lane.b32.xlu0 %v4187_v5, %s2934_s13 }
 0x276   : > { %v1289_v43 = vpop.permute.xlu0 %1288  ;;  %v2412_v16 = vpop.permute.xlu1 %2411 }
 0x277   : > { %1396 = vst.msk [vmem:[%s3943_s24 + $0xc8] sm:$0xff] %vm1370_vm0, %v1363_v31  ;;  %v1326_v37 = vmax.f32 %v3902_v38, %v1289_v43  ;;  %v4197_v13 = vmax.f32 %v3895_v28, %v2412_v16  ;;  %v4458_v31 = vld [vmem:[#allocation13_spill] sm:$0xff] }
 0x279   : > { %v1364_v48 = vadd.f32 %v3935_v9, %v1326_v37  ;;  %2507 = vrot.lane.b32.xlu1 %v4197_v13, %s2934_s13 }
 0x27a   : > { %v2414_v18 = vpop.permute.xlu0 %2413  ;;  %v1291_v20 = vpop.permute.xlu1 %1290 }
 0x27b   : > { %1397 = vst.msk [vmem:[%s3943_s24 + $0xd0] sm:$0xff] %vm1370_vm0, %v1364_v48  ;;  %v4205_v50 = vmax.f32 %v4453_v15, %v2414_v18  ;;  %v1327_v10 = vmax.f32 %v4454_v57, %v1291_v20 }
 0x27d   : > { %v1365_v38 = vadd.f32 %v3935_v9, %v1327_v10  ;;  %2509 = vrot.lane.b32.xlu0 %v4205_v50, %s2934_s13 }
 0x27e   : > { %v1293_v28 = vpop.permute.xlu0 %1292  ;;  %v2416_v32 = vpop.permute.xlu1 %2415 }
 0x27f   : > { %1398 = vst.msk [vmem:[%s3943_s24 + $0xd8] sm:$0xff] %vm1370_vm0, %v1365_v38  ;;  %v1328_v11 = vmax.f32 %v4455_v21, %v1293_v28  ;;  %v4215_v12 = vmax.f32 %v3913_v42, %v2416_v32 }
 0x281   : > { %v1366_v2 = vadd.f32 %v3935_v9, %v1328_v11  ;;  %2511 = vrot.lane.b32.xlu1 %v4215_v12, %s2934_s13 }
 0x282   : > { %v2418_v8 = vpop.permute.xlu0 %2417  ;;  %v1295_v62 = vpop.permute.xlu1 %1294 }
 0x283   : > { %1399 = vst.msk [vmem:[%s3943_s24 + $0xe0] sm:$0xff] %vm1370_vm0, %v1366_v2  ;;  %v4223_v41 = vmax.f32 %v4456_v51, %v2418_v8  ;;  %v1329_v26 = vmax.f32 %v4457_v19, %v1295_v62 }
 0x285   : > { %v1367_v6 = vadd.f32 %v3935_v9, %v1329_v26  ;;  %2513 = vrot.lane.b32.xlu0 %v4223_v41, %s2934_s13 }
 0x286   : > { %v2420_v42 = vpop.permute.xlu1 %2419 }
 0x287   : > { %1400 = vst.msk [vmem:[%s3943_s24 + $0xe8] sm:$0xff] %vm1370_vm0, %v1367_v6  ;;  %v4232_v52 = vmax.f32 %v3938_v63, %v2420_v42  ;;  %v1297_v25 = vpop.permute.xlu0 %1296 }
 0x288   : > { %v1330_v34 = vmax.f32 %v3954_v55, %v1297_v25 }
 0x289   : > { %2515 = vrot.lane.b32.xlu1 %v4232_v52, %s2934_s13 }
 0x28a   : > { %v1368_v35 = vadd.f32 %v3935_v9, %v1330_v34 }
 0x28b   : > { %v2422_v1 = vpop.permute.xlu0 %2421  ;;  %v1299_v49 = vpop.permute.xlu1 %1298 }
 0x28c   : > { %1401 = vst.msk [vmem:[%s3943_s24 + $0xf0] sm:$0xff] %vm1370_vm0, %v1368_v35  ;;  %v4241_v56 = vmax.f32 %v3961_v59, %v2422_v1  ;;  %v1331_v43 = vmax.f32 %v4458_v31, %v1299_v49 }
 0x28e   : > { %v1369_v63 = vadd.f32 %v3935_v9, %v1331_v43  ;;  %2517 = vrot.lane.b32.xlu0 %v4241_v56, %s2934_s13 }
 0x28f   : > { %v2462_v55 = vpop.permute.xlu0 %2461  ;;  %v2424_v16 = vpop.permute.xlu1 %2423 }
 0x290   : > { %1402 = vst.msk [vmem:[%s3943_s24 + $0xf8] sm:$0xff] %vm1370_vm0, %v1369_v63  ;;  %v2525_v37 = vmax.f32 %v3979_v29, %v2462_v55  ;;  %v4251_v48 = vmax.f32 %v3969_v14, %v2424_v16 }
 0x292   : > { %v2557_v59 = vadd.f32 %v3935_v9, %v2525_v37  ;;  %2519 = vrot.lane.b32.xlu1 %v4251_v48, %s2934_s13 }
 0x293   : > { %v2426_v18 = vpop.permute.xlu0 %2425  ;;  %v2464_v20 = vpop.permute.xlu1 %2463 }
 0x294   : > { %2589 = vst.msk [vmem:[%s3943_s24 + $0x100] sm:$0xff] %vm1370_vm0, %v2557_v59  ;;  %v4259_v15 = vmax.f32 %v3987_v58, %v2426_v18  ;;  %v2526_v57 = vmax.f32 %v3993_v17, %v2464_v20 }
 0x296   : > { %v2558_v29 = vadd.f32 %v3935_v9, %v2526_v57  ;;  %2521 = vrot.lane.b32.xlu0 %v4259_v15, %s2934_s13 }
 0x297   : > { %v2466_v14 = vpop.permute.xlu0 %2465  ;;  %v2428_v10 = vpop.permute.xlu1 %2427 }
 0x298   : > { %2590 = vst.msk [vmem:[%s3943_s24 + $0x108] sm:$0xff] %vm1370_vm0, %v2558_v29  ;;  %v2527_v38 = vmax.f32 %v4005_v3, %v2466_v14  ;;  %v4269_v28 = vmax.f32 %v3995_v33, %v2428_v10 }
 0x29a   : > { %v2559_v58 = vadd.f32 %v3935_v9, %v2527_v38  ;;  %2523 = vrot.lane.b32.xlu1 %v4269_v28, %s2934_s13 }
 0x29b   : > { %v2468_v17 = vpop.permute.xlu1 %2467 }
 0x29c   : > { %2591 = vst.msk [vmem:[%s3943_s24 + $0x110] sm:$0xff] %vm1370_vm0, %v2559_v58  ;;  %v2528_v32 = vmax.f32 %v4017_v24, %v2468_v17 }
 0x29e   : > { %v2560_v21 = vadd.f32 %v3935_v9, %v2528_v32 }
 0x29f   : > { %v2470_v11 = vpop.permute.xlu0 %2469 }
 0x2a0   : > { %2592 = vst.msk [vmem:[%s3943_s24 + $0x118] sm:$0xff] %vm1370_vm0, %v2560_v21  ;;  %v2529_v33 = vmax.f32 %v4025_v46, %v2470_v11 }
 0x2a2   : > { %v2561_v3 = vadd.f32 %v3935_v9, %v2529_v33 }
 0x2a3   : > { %v2472_v2 = vpop.permute.xlu1 %2471 }
 0x2a4   : > { %2593 = vst.msk [vmem:[%s3943_s24 + $0x120] sm:$0xff] %vm1370_vm0, %v2561_v3  ;;  %v2530_v8 = vmax.f32 %v4035_v40, %v2472_v2 }
 0x2a6   : > { %v2562_v62 = vadd.f32 %v3935_v9, %v2530_v8 }
 0x2a7   : > { %v2474_v51 = vpop.permute.xlu0 %2473 }
 0x2a8   : > { %2594 = vst.msk [vmem:[%s3943_s24 + $0x128] sm:$0xff] %vm1370_vm0, %v2562_v62  ;;  %v2531_v24 = vmax.f32 %v4043_v4, %v2474_v51 }
 0x2aa   : > { %v2563_v19 = vadd.f32 %v3935_v9, %v2531_v24 }
 0x2ab   : > { %v2476_v26 = vpop.permute.xlu1 %2475 }
 0x2ac   : > { %2595 = vst.msk [vmem:[%s3943_s24 + $0x130] sm:$0xff] %vm1370_vm0, %v2563_v19  ;;  %v2532_v46 = vmax.f32 %v4053_v53, %v2476_v26 }
 0x2ae   : > { %v2564_v6 = vadd.f32 %v3935_v9, %v2532_v46 }
 0x2af   : > { %v2478_v42 = vpop.permute.xlu0 %2477 }
 0x2b0   : > { %2596 = vst.msk [vmem:[%s3943_s24 + $0x138] sm:$0xff] %vm1370_vm0, %v2564_v6  ;;  %v2533_v40 = vmax.f32 %v4061_v7, %v2478_v42 }
 0x2b2   : > { %v2565_v25 = vadd.f32 %v3935_v9, %v2533_v40 }
 0x2b3   : > { %v2480_v34 = vpop.permute.xlu1 %2479 }
 0x2b4   : > { %2597 = vst.msk [vmem:[%s3943_s24 + $0x140] sm:$0xff] %vm1370_vm0, %v2565_v25  ;;  %v2534_v4 = vmax.f32 %v4071_v61, %v2480_v34 }
 0x2b6   : > { %v2566_v35 = vadd.f32 %v3935_v9, %v2534_v4 }
 0x2b7   : > { %v2482_v1 = vpop.permute.xlu0 %2481 }
 0x2b8   : > { %2598 = vst.msk [vmem:[%s3943_s24 + $0x148] sm:$0xff] %vm1370_vm0, %v2566_v35  ;;  %v2535_v53 = vmax.f32 %v4079_v30, %v2482_v1 }
 0x2ba   : > { %v2567_v49 = vadd.f32 %v3935_v9, %v2535_v53 }
 0x2bb   : > { %v2484_v31 = vpop.permute.xlu1 %2483 }
 0x2bc   : > { %2599 = vst.msk [vmem:[%s3943_s24 + $0x150] sm:$0xff] %vm1370_vm0, %v2567_v49  ;;  %v2536_v7 = vmax.f32 %v4089_v45, %v2484_v31 }
 0x2be   : > { %v2568_v43 = vadd.f32 %v3935_v9, %v2536_v7 }
 0x2bf   : > { %v2486_v63 = vpop.permute.xlu0 %2485 }
 0x2c0   : > { %2600 = vst.msk [vmem:[%s3943_s24 + $0x158] sm:$0xff] %vm1370_vm0, %v2568_v43  ;;  %v2537_v61 = vmax.f32 %v4097_v39, %v2486_v63 }
 0x2c2   : > { %v2569_v55 = vadd.f32 %v3935_v9, %v2537_v61 }
 0x2c3   : > { %v2488_v16 = vpop.permute.xlu1 %2487 }
 0x2c4   : > { %2601 = vst.msk [vmem:[%s3943_s24 + $0x160] sm:$0xff] %vm1370_vm0, %v2569_v55  ;;  %v2538_v30 = vmax.f32 %v4107_v36, %v2488_v16 }
 0x2c6   : > { %v2570_v37 = vadd.f32 %v3935_v9, %v2538_v30 }
 0x2c7   : > { %v2490_v59 = vpop.permute.xlu0 %2489 }
 0x2c8   : > { %2602 = vst.msk [vmem:[%s3943_s24 + $0x168] sm:$0xff] %vm1370_vm0, %v2570_v37  ;;  %v2539_v45 = vmax.f32 %v4115_v0, %v2490_v59 }
 0x2ca   : > { %v2571_v18 = vadd.f32 %v3935_v9, %v2539_v45 }
 0x2cb   : > { %v2492_v20 = vpop.permute.xlu1 %2491 }
 0x2cc   : > { %2603 = vst.msk [vmem:[%s3943_s24 + $0x170] sm:$0xff] %vm1370_vm0, %v2571_v18  ;;  %v2540_v39 = vmax.f32 %v4125_v27, %v2492_v20 }
 0x2ce   : > { %v2572_v57 = vadd.f32 %v3935_v9, %v2540_v39 }
 0x2cf   : > { %v2494_v29 = vpop.permute.xlu0 %2493 }
 0x2d0   : > { %2604 = vst.msk [vmem:[%s3943_s24 + $0x178] sm:$0xff] %vm1370_vm0, %v2572_v57  ;;  %v2541_v36 = vmax.f32 %v4133_v47, %v2494_v29 }
 0x2d2   : > { %v2573_v14 = vadd.f32 %v3935_v9, %v2541_v36 }
 0x2d3   : > { %v2496_v10 = vpop.permute.xlu1 %2495 }
 0x2d4   : > { %2605 = vst.msk [vmem:[%s3943_s24 + $0x180] sm:$0xff] %vm1370_vm0, %v2573_v14  ;;  %v2542_v0 = vmax.f32 %v4143_v23, %v2496_v10 }
 0x2d6   : > { %v2574_v38 = vadd.f32 %v3935_v9, %v2542_v0 }
 0x2d7   : > { %v2498_v58 = vpop.permute.xlu0 %2497 }
 0x2d8   : > { %2606 = vst.msk [vmem:[%s3943_s24 + $0x188] sm:$0xff] %vm1370_vm0, %v2574_v38  ;;  %v2543_v27 = vmax.f32 %v4151_v22, %v2498_v58 }
 0x2da   : > { %v2575_v17 = vadd.f32 %v3935_v9, %v2543_v27 }
 0x2db   : > { %v2500_v32 = vpop.permute.xlu1 %2499 }
 0x2dc   : > { %2607 = vst.msk [vmem:[%s3943_s24 + $0x190] sm:$0xff] %vm1370_vm0, %v2575_v17  ;;  %v2544_v47 = vmax.f32 %v4161_v60, %v2500_v32 }
 0x2de   : > { %v2576_v21 = vadd.f32 %v3935_v9, %v2544_v47 }
 0x2df   : > { %v2502_v11 = vpop.permute.xlu0 %2501 }
 0x2e0   : > { %2608 = vst.msk [vmem:[%s3943_s24 + $0x198] sm:$0xff] %vm1370_vm0, %v2576_v21  ;;  %v2545_v23 = vmax.f32 %v4169_v54, %v2502_v11 }
 0x2e2   : > { %v2577_v33 = vadd.f32 %v3935_v9, %v2545_v23 }
 0x2e3   : > { %v2504_v3 = vpop.permute.xlu1 %2503 }
 0x2e4   : > { %2609 = vst.msk [vmem:[%s3943_s24 + $0x1a0] sm:$0xff] %vm1370_vm0, %v2577_v33  ;;  %v2546_v22 = vmax.f32 %v4179_v44, %v2504_v3 }
 0x2e6   : > { %v2578_v2 = vadd.f32 %v3935_v9, %v2546_v22 }
 0x2e7   : > { %v2506_v8 = vpop.permute.xlu0 %2505 }
 0x2e8   : > { %2610 = vst.msk [vmem:[%s3943_s24 + $0x1a8] sm:$0xff] %vm1370_vm0, %v2578_v2  ;;  %v2547_v60 = vmax.f32 %v4187_v5, %v2506_v8 }
 0x2ea   : > { %v2579_v62 = vadd.f32 %v3935_v9, %v2547_v60 }
 0x2eb   : > { %v2508_v51 = vpop.permute.xlu1 %2507 }
 0x2ec   : > { %2611 = vst.msk [vmem:[%s3943_s24 + $0x1b0] sm:$0xff] %vm1370_vm0, %v2579_v62  ;;  %v2548_v54 = vmax.f32 %v4197_v13, %v2508_v51 }
 0x2ee   : > { %v2580_v24 = vadd.f32 %v3935_v9, %v2548_v54 }
 0x2ef   : > { %v2510_v19 = vpop.permute.xlu0 %2509 }
 0x2f0   : > { %2612 = vst.msk [vmem:[%s3943_s24 + $0x1b8] sm:$0xff] %vm1370_vm0, %v2580_v24  ;;  %v2549_v44 = vmax.f32 %v4205_v50, %v2510_v19 }
 0x2f2   : > { %v2581_v26 = vadd.f32 %v3935_v9, %v2549_v44 }
 0x2f3   : > { %v2512_v46 = vpop.permute.xlu1 %2511 }
 0x2f4   : > { %2613 = vst.msk [vmem:[%s3943_s24 + $0x1c0] sm:$0xff] %vm1370_vm0, %v2581_v26  ;;  %v2550_v5 = vmax.f32 %v4215_v12, %v2512_v46 }
 0x2f6   : > { %v2582_v6 = vadd.f32 %v3935_v9, %v2550_v5 }
 0x2f7   : > { %v2514_v42 = vpop.permute.xlu0 %2513 }
 0x2f8   : > { %2614 = vst.msk [vmem:[%s3943_s24 + $0x1c8] sm:$0xff] %vm1370_vm0, %v2582_v6  ;;  %v2551_v13 = vmax.f32 %v4223_v41, %v2514_v42 }
 0x2fa   : > { %v2583_v40 = vadd.f32 %v3935_v9, %v2551_v13 }
 0x2fb   : > { %v2516_v25 = vpop.permute.xlu1 %2515 }
 0x2fc   : > { %2615 = vst.msk [vmem:[%s3943_s24 + $0x1d0] sm:$0xff] %vm1370_vm0, %v2583_v40  ;;  %v2552_v50 = vmax.f32 %v4232_v52, %v2516_v25 }
 0x2fe   : > { %v2584_v34 = vadd.f32 %v3935_v9, %v2552_v50 }
 0x300   : > { %2616 = vst.msk [vmem:[%s3943_s24 + $0x1d8] sm:$0xff] %vm1370_vm0, %v2584_v34  ;;  %v2518_v12 = vpop.permute.xlu0 %2517 }
 0x301   : > { %v2553_v4 = vmax.f32 %v4241_v56, %v2518_v12 }
 0x303   : > { %v2585_v35 = vadd.f32 %v3935_v9, %v2553_v4 }
 0x304   : > { %v2520_v1 = vpop.permute.xlu1 %2519 }
 0x305   : > { %2617 = vst.msk [vmem:[%s3943_s24 + $0x1e0] sm:$0xff] %vm1370_vm0, %v2585_v35  ;;  %v2554_v41 = vmax.f32 %v4251_v48, %v2520_v1 }
 0x307   : > { %v2586_v53 = vadd.f32 %v3935_v9, %v2554_v41 }
 0x308   : > { %v2522_v49 = vpop.permute.xlu0 %2521 }
 0x309   : > { %2618 = vst.msk [vmem:[%s3943_s24 + $0x1e8] sm:$0xff] %vm1370_vm0, %v2586_v53  ;;  %v2555_v52 = vmax.f32 %v4259_v15, %v2522_v49 }
 0x30b   : > { %v2587_v31 = vadd.f32 %v3935_v9, %v2555_v52 }
 0x30c   : > { %v2524_v7 = vpop.permute.xlu1 %2523 }
 0x30d   : > { %2619 = vst.msk [vmem:[%s3943_s24 + $0x1f0] sm:$0xff] %vm1370_vm0, %v2587_v31  ;;  %v2556_v56 = vmax.f32 %v4269_v28, %v2524_v7 }
 0x30f   : > { %v2588_v43 = vadd.f32 %v3935_v9, %v2556_v56 }
 0x311   : > { %2620 = vst.msk [vmem:[%s3943_s24 + $0x1f8] sm:$0xff] %vm1370_vm0, %v2588_v43 }
 0x312 PF: > { %s13_s12 = sadd.s32 1, %s2931_s12  }
 0x313   : > { %p10_p4 = scmp.ge.s32.totalorder %s13_s12, 6  }
 0x315   :  { %12 = sbr.rel (!%p10_p4) target bundleno = 1 (0x1), region = 62 }

</bundles_post_ra>
